<compile_context>
chip_gen: v7x
topology: tpu7x:2x2x1
jax: 0.10.0
libtpu: 0.0.40
codegen_flags: <defaults>
</compile_context>

<pallas_src>
import functools
import math

import jax
import jax.numpy as jnp
from jax.experimental import pallas as pl
from jax.experimental.pallas import tpu as pltpu


# --------------------------- Fused MHA kernel ------------------------------ #
def _mha_kernel(*refs, h, d_k, has_mask, compute_dtype, approx_recip):
    if has_mask:
        (xq_ref, xk_ref, xv_ref, mask_ref,
         wq_ref, wk_ref, wv_ref, wo_ref,
         bq_ref, bk_ref, bv_ref, bo_ref, o_ref) = refs
    else:
        (xq_ref, xk_ref, xv_ref,
         wq_ref, wk_ref, wv_ref, wo_ref,
         bq_ref, bk_ref, bv_ref, bo_ref, o_ref) = refs
        mask_ref = None

    f32 = jnp.float32
    cdt = compute_dtype

    xq = xq_ref[...].astype(cdt)            # (tq, D)
    xk = xk_ref[...].astype(cdt)            # (Sk, D)
    xv = xv_ref[...].astype(cdt)            # (Sk, D)

    # Fused Q/K/V projections; weights are pre-transposed, pre-cast, and the
    # 1/sqrt(d_k) scale is already folded into wq/bq. MXU accumulates in f32.
    q = (jnp.dot(xq, wq_ref[...], preferred_element_type=f32) + bq_ref[...]).astype(cdt)
    k = (jnp.dot(xk, wk_ref[...], preferred_element_type=f32) + bk_ref[...]).astype(cdt)
    v = (jnp.dot(xv, wv_ref[...], preferred_element_type=f32) + bv_ref[...]).astype(cdt)

    # Hoisted mask bias: computed ONCE per grid step, shared by all heads.
    bias = None
    if has_mask:
        m = mask_ref[...].astype(jnp.int32)                 # (tq, Sk)
        bias = jnp.where(m == 0, f32(-1e9), f32(0.0))

    wo = wo_ref[...]                                        # (D, D) = W_o^T
    tq = xq_ref.shape[0]
    d_model = wo.shape[1]

    # Output bias folded into the accumulator init.
    acc = jnp.broadcast_to(bo_ref[...].astype(f32), (tq, d_model))

    # TODO(synk): switch to lax.fori_loop(unroll=2) once h is large (8-16) to
    # bound vreg live ranges; h is small here so a static unroll is fine.
    for head in range(h):
        lo = head * d_k
        qh = q[:, lo:lo + d_k]
        kh = k[:, lo:lo + d_k]
        vh = v[:, lo:lo + d_k]

        # scores = (q_h / sqrt(d_k)) @ k_h^T  (contract last dims, no transpose)
        scores = jax.lax.dot_general(
            qh, kh, (((1,), (1,)), ((), ())), preferred_element_type=f32)
        if bias is not None:
            scores = scores + bias

        # numerically stable softmax (kept in f32 on all chips)
        scores = scores - jnp.max(scores, axis=-1, keepdims=True)
        p = jnp.exp(scores)
        p = p * pl.reciprocal(jnp.sum(p, axis=-1, keepdims=True),
                              approx=approx_recip)
        # TODO(synk): nn.Dropout(p=0.1) on p_attn is identity in eval mode; not applied.

        oh = jnp.dot(p.astype(cdt), vh, preferred_element_type=f32)   # (tq, d_k)
        # Fused output projection:  x @ Wo^T == sum_h x_h @ Wo^T[h-block, :]
        acc = acc + jnp.dot(oh.astype(cdt), wo[lo:lo + d_k, :],
                            preferred_element_type=f32)

    o_ref[...] = acc.astype(o_ref.dtype)


# ------------------------------ Wrappers ----------------------------------- #
def prepare_mha_params(params, h, compute_dtype=jnp.float32):
    """One-time prep: transpose torch-style (d_out, d_in) weights to (d_in, d_out),
    fold the 1/sqrt(d_k) attention scale into W_q / b_q, cast weights to the
    MXU compute dtype, and reshape biases to (1, d_out) (biases stay f32)."""
    d_model = params["w_q"].shape[0]
    d_k = d_model // h
    scale = 1.0 / math.sqrt(d_k)

    prep = {"compute_dtype": compute_dtype}
    for name in ("q", "k", "v", "o"):
        w_t = jnp.asarray(params[f"w_{name}"], jnp.float32).T
        b = jnp.asarray(params[f"b_{name}"], jnp.float32).reshape(1, -1)
        if name == "q":                       # fold 1/sqrt(d_k) into Q projection
            w_t = w_t * scale
            b = b * scale
        prep[f"w_{name}_t"] = w_t.astype(compute_dtype)
        prep[f"b_{name}"] = b                 # added post-MXU in f32
    return prep


def multi_headed_attention(prep, query, key, value, mask, h,
                           q_block=None, approx_recip=None):
    B, Sq, D = query.shape
    Sk = key.shape[1]
    d_k = D // h
    compute_dtype = prep["compute_dtype"]
    if approx_recip is None:
        # EUP approximate reciprocal only when already at bf16 precision.
        approx_recip = compute_dtype != jnp.float32

    # Pick a q-tile size: bounds the per-step working set (scores are (tq, Sk))
    # and gives the megacore a second parallel axis when B is small.
    if q_block is not None and Sq % q_block == 0:
        tq = q_block
    else:
        tq = Sq
        for cand in (512, 256, 128):
            if Sq % cand == 0:
                tq = cand
                break
    nq = Sq // tq

    has_mask = mask is not None
    args = [query, key, value]
    in_specs = [
        pl.BlockSpec((None, tq, D), lambda b, qi: (b, qi, 0)),   # q tile
        pl.BlockSpec((None, Sk, D), lambda b, qi: (b, 0, 0)),    # full K rows
        pl.BlockSpec((None, Sk, D), lambda b, qi: (b, 0, 0)),    # full V rows
    ]

    if has_mask:
        m = jnp.asarray(mask)
        if m.ndim == 2:                       # (Sq, Sk) -> broadcast over batch
            m = m[None]
        elif m.ndim == 4:                     # torch-style (B, 1, Sq, Sk)
            m = m[:, 0]
        mB = m.shape[0]
        mask_i8 = (m != 0).astype(jnp.int8)   # tiny int8, NOT broadcast f32
        if mB == 1:
            # Batch-broadcast mask: VMEM-resident across the batch grid axis.
            mask_spec = pl.BlockSpec((None, tq, Sk), lambda b, qi: (0, qi, 0))
        else:
            mask_spec = pl.BlockSpec((None, tq, Sk), lambda b, qi: (b, qi, 0))
        args.append(mask_i8)
        in_specs.append(mask_spec)

    w_spec = pl.BlockSpec((D, D), lambda b, qi: (0, 0))     # resident across grid
    b_spec = pl.BlockSpec((1, D), lambda b, qi: (0, 0))
    args += [prep["w_q_t"], prep["w_k_t"], prep["w_v_t"], prep["w_o_t"],
             prep["b_q"], prep["b_k"], prep["b_v"], prep["b_o"]]
    in_specs += [w_spec] * 4 + [b_spec] * 4

    kernel = functools.partial(
        _mha_kernel, h=h, d_k=d_k, has_mask=has_mask,
        compute_dtype=compute_dtype, approx_recip=approx_recip)

    return pl.pallas_call(
        kernel,
        out_shape=jax.ShapeDtypeStruct((B, Sq, D), jnp.float32),
        grid=(B, nq),
        in_specs=in_specs,
        out_specs=pl.BlockSpec((None, tq, D), lambda b, qi: (b, qi, 0)),
        compiler_params=pltpu.CompilerParams(
            dimension_semantics=("parallel", "parallel"),
            vmem_limit_bytes=64 * 1024 * 1024),
    )(*args)


# ------------------------------- Reference --------------------------------- #
def reference_mha(params, query, key, value, mask, h):
    B, Sq, D = query.shape
    d_k = D // h

    def lin(x, w, b):
        return x @ w.T + b

    def split(x):
        return x.reshape(B, -1, h, d_k).transpose(0, 2, 1, 3)

    q = split(lin(query, params["w_q"], params["b_q"]))
    k = split(lin(key, params["w_k"], params["b_k"]))
    v = split(lin(value, params["w_v"], params["b_v"]))
    scores = jnp.einsum("bhqd,bhkd->bhqk", q, k) / math.sqrt(d_k)
    scores = jnp.where(mask[:, None, :, :] == 0, -1e9, scores)
    p = jax.nn.softmax(scores, axis=-1)
    x = jnp.einsum("bhqk,bhkd->bhqd", p, v)
    x = x.transpose(0, 2, 1, 3).reshape(B, Sq, D)
    return lin(x, params["w_o"], params["b_o"])


# ---------------------------------- Main ----------------------------------- #
if __name__ == "__main__":
    h, d_model = 4, 32
    B, S = 2, 8

    root = jax.random.PRNGKey(0)
    keys = jax.random.split(root, 12)

    def init_linear(kw, kb, d_out, d_in):
        bound = 1.0 / math.sqrt(d_in)   # torch nn.Linear default init range
        w = jax.random.uniform(kw, (d_out, d_in), jnp.float32, -bound, bound)
        b = jax.random.uniform(kb, (d_out,), jnp.float32, -bound, bound)
        return w, b

    params = {}
    for i, name in enumerate(["q", "k", "v", "o"]):
        w, b = init_linear(keys[2 * i], keys[2 * i + 1], d_model, d_model)
        params[f"w_{name}"] = w
        params[f"b_{name}"] = b

    query = jax.random.normal(keys[8], (B, S, d_model), jnp.float32)
    key_in = jax.random.normal(keys[9], (B, S, d_model), jnp.float32)
    value = jax.random.normal(keys[10], (B, S, d_model), jnp.float32)

    # causal mask (1 = attend, 0 = masked), batch-broadcast like subsequent_mask
    causal = jnp.tril(jnp.ones((S, S), jnp.int32))
    mask_bcast = causal[None]                       # (1, S, S) — passed un-broadcast
    mask_full = jnp.broadcast_to(causal, (B, S, S))  # only for the reference

    ref = reference_mha(params, query, key_in, value, mask_full, h)

    # --- exact f32 path (all chips; v5e preferred path) ---------------------
    prep_f32 = prepare_mha_params(params, h, compute_dtype=jnp.float32)
    out = multi_headed_attention(prep_f32, query, key_in, value, mask_bcast, h)
    out = jax.block_until_ready(out)
    assert out.shape == (B, S, d_model)
    assert jnp.allclose(out, ref, atol=1e-4, rtol=1e-4), "f32 Pallas/reference mismatch"

    # --- bf16 MXU-operand path (v6e / v7x), f32 accumulate & f32 softmax ----
    prep_bf16 = prepare_mha_params(params, h, compute_dtype=jnp.bfloat16)
    out_bf16 = multi_headed_attention(prep_bf16, query, key_in, value, mask_bcast, h)
    out_bf16 = jax.block_until_ready(out_bf16)
    assert jnp.allclose(out_bf16, ref, atol=1e-1, rtol=1e-1), "bf16 Pallas/reference mismatch"

    print("KERNEL_OK")
</pallas_src>

<mosaic_0001>
module attributes {stable_mosaic.version = 11 : i64} {
  func.func @_mha_kernel(%arg0: i32, %arg1: i32, %arg2: memref<1x8x32xf32, #tpu.memory_space<vmem>>, %arg3: memref<1x8x32xf32, #tpu.memory_space<vmem>>, %arg4: memref<1x8x32xf32, #tpu.memory_space<vmem>>, %arg5: memref<1x8x8xi8, #tpu.memory_space<vmem>>, %arg6: memref<32x32xf32, #tpu.memory_space<vmem>>, %arg7: memref<32x32xf32, #tpu.memory_space<vmem>>, %arg8: memref<32x32xf32, #tpu.memory_space<vmem>>, %arg9: memref<32x32xf32, #tpu.memory_space<vmem>>, %arg10: memref<1x32xf32, #tpu.memory_space<vmem>>, %arg11: memref<1x32xf32, #tpu.memory_space<vmem>>, %arg12: memref<1x32xf32, #tpu.memory_space<vmem>>, %arg13: memref<1x32xf32, #tpu.memory_space<vmem>>, %arg14: memref<1x8x32xf32, #tpu.memory_space<vmem>>) attributes {dimension_semantics = [#tpu.dimension_semantics<parallel>, #tpu.dimension_semantics<parallel>], iteration_bounds = array<i64: 2, 1>, scalar_prefetch = 0 : i64, scratch_operands = 0 : i64, tpu.core_type = #tpu.core_type<tc>, window_params = [{transform_indices = @transform_0, window_bounds = array<i64: 1, 8, 32>}, {transform_indices = @transform_1, window_bounds = array<i64: 1, 8, 32>}, {transform_indices = @transform_2, window_bounds = array<i64: 1, 8, 32>}, {transform_indices = @transform_3, window_bounds = array<i64: 1, 8, 8>}, {pipeline_mode = #tpu.pipeline_mode<synchronous>, transform_indices = @transform_4, window_bounds = array<i64: 32, 32>}, {pipeline_mode = #tpu.pipeline_mode<synchronous>, transform_indices = @transform_5, window_bounds = array<i64: 32, 32>}, {pipeline_mode = #tpu.pipeline_mode<synchronous>, transform_indices = @transform_6, window_bounds = array<i64: 32, 32>}, {pipeline_mode = #tpu.pipeline_mode<synchronous>, transform_indices = @transform_7, window_bounds = array<i64: 32, 32>}, {pipeline_mode = #tpu.pipeline_mode<synchronous>, transform_indices = @transform_8, window_bounds = array<i64: 1, 32>}, {pipeline_mode = #tpu.pipeline_mode<synchronous>, transform_indices = @transform_9, window_bounds = array<i64: 1, 32>}, {pipeline_mode = #tpu.pipeline_mode<synchronous>, transform_indices = @transform_10, window_bounds = array<i64: 1, 32>}, {pipeline_mode = #tpu.pipeline_mode<synchronous>, transform_indices = @transform_11, window_bounds = array<i64: 1, 32>}, {transform_indices = @transform_12, window_bounds = array<i64: 1, 8, 32>}]} {
    %c0 = arith.constant 0 : index
    %c0_0 = arith.constant 0 : index
    %c0_1 = arith.constant 0 : index
    %0 = vector.load %arg2[%c0, %c0_0, %c0_1] : memref<1x8x32xf32, #tpu.memory_space<vmem>>, vector<1x8x32xf32>
    %1 = vector.shape_cast %0 : vector<1x8x32xf32> to vector<8x32xf32>
    %c0_2 = arith.constant 0 : index
    %c0_3 = arith.constant 0 : index
    %c0_4 = arith.constant 0 : index
    %2 = vector.load %arg3[%c0_2, %c0_3, %c0_4] : memref<1x8x32xf32, #tpu.memory_space<vmem>>, vector<1x8x32xf32>
    %3 = vector.shape_cast %2 : vector<1x8x32xf32> to vector<8x32xf32>
    %c0_5 = arith.constant 0 : index
    %c0_6 = arith.constant 0 : index
    %c0_7 = arith.constant 0 : index
    %4 = vector.load %arg4[%c0_5, %c0_6, %c0_7] : memref<1x8x32xf32, #tpu.memory_space<vmem>>, vector<1x8x32xf32>
    %5 = vector.shape_cast %4 : vector<1x8x32xf32> to vector<8x32xf32>
    %c0_8 = arith.constant 0 : index
    %c0_9 = arith.constant 0 : index
    %6 = vector.load %arg6[%c0_8, %c0_9] : memref<32x32xf32, #tpu.memory_space<vmem>>, vector<32x32xf32>
    %cst = arith.constant dense<0.000000e+00> : vector<8x32xf32>
    %7 = tpu.matmul %1, %6, %cst {dimension_numbers = #tpu.dot_dimension_numbers<[1], [0], [0], [1], [0, 0, 1, 1], [], []>} : vector<8x32xf32>, vector<32x32xf32>, vector<8x32xf32> -> vector<8x32xf32>
    %c0_10 = arith.constant 0 : index
    %c0_11 = arith.constant 0 : index
    %8 = vector.load %arg10[%c0_10, %c0_11] : memref<1x32xf32, #tpu.memory_space<vmem>>, vector<1x32xf32>
    %9 = vector.broadcast %8 : vector<1x32xf32> to vector<8x32xf32>
    %10 = arith.addf %7, %9 : vector<8x32xf32>
    %c0_12 = arith.constant 0 : index
    %c0_13 = arith.constant 0 : index
    %11 = vector.load %arg7[%c0_12, %c0_13] : memref<32x32xf32, #tpu.memory_space<vmem>>, vector<32x32xf32>
    %cst_14 = arith.constant dense<0.000000e+00> : vector<8x32xf32>
    %12 = tpu.matmul %3, %11, %cst_14 {dimension_numbers = #tpu.dot_dimension_numbers<[1], [0], [0], [1], [0, 0, 1, 1], [], []>} : vector<8x32xf32>, vector<32x32xf32>, vector<8x32xf32> -> vector<8x32xf32>
    %c0_15 = arith.constant 0 : index
    %c0_16 = arith.constant 0 : index
    %13 = vector.load %arg11[%c0_15, %c0_16] : memref<1x32xf32, #tpu.memory_space<vmem>>, vector<1x32xf32>
    %14 = vector.broadcast %13 : vector<1x32xf32> to vector<8x32xf32>
    %15 = arith.addf %12, %14 : vector<8x32xf32>
    %c0_17 = arith.constant 0 : index
    %c0_18 = arith.constant 0 : index
    %16 = vector.load %arg8[%c0_17, %c0_18] : memref<32x32xf32, #tpu.memory_space<vmem>>, vector<32x32xf32>
    %cst_19 = arith.constant dense<0.000000e+00> : vector<8x32xf32>
    %17 = tpu.matmul %5, %16, %cst_19 {dimension_numbers = #tpu.dot_dimension_numbers<[1], [0], [0], [1], [0, 0, 1, 1], [], []>} : vector<8x32xf32>, vector<32x32xf32>, vector<8x32xf32> -> vector<8x32xf32>
    %c0_20 = arith.constant 0 : index
    %c0_21 = arith.constant 0 : index
    %18 = vector.load %arg12[%c0_20, %c0_21] : memref<1x32xf32, #tpu.memory_space<vmem>>, vector<1x32xf32>
    %19 = vector.broadcast %18 : vector<1x32xf32> to vector<8x32xf32>
    %20 = arith.addf %17, %19 : vector<8x32xf32>
    %c0_22 = arith.constant 0 : index
    %c0_23 = arith.constant 0 : index
    %c0_24 = arith.constant 0 : index
    %21 = vector.load %arg5[%c0_22, %c0_23, %c0_24] : memref<1x8x8xi8, #tpu.memory_space<vmem>>, vector<1x8x8xi8>
    %22 = vector.shape_cast %21 : vector<1x8x8xi8> to vector<8x8xi8>
    %23 = arith.extsi %22 : vector<8x8xi8> to vector<8x8xi32>
    %c0_i32 = arith.constant 0 : i32
    %24 = vector.broadcast %c0_i32 : i32 to vector<8x8xi32>
    %25 = arith.cmpi eq, %23, %24 : vector<8x8xi32>
    %cst_25 = arith.constant -1.000000e+09 : f32
    %cst_26 = arith.constant 0.000000e+00 : f32
    %26 = vector.broadcast %cst_25 : f32 to vector<8x8xf32>
    %27 = vector.broadcast %cst_26 : f32 to vector<8x8xf32>
    %28 = arith.select %25, %26, %27 : vector<8x8xi1>, vector<8x8xf32>
    %c0_27 = arith.constant 0 : index
    %c0_28 = arith.constant 0 : index
    %29 = vector.load %arg9[%c0_27, %c0_28] : memref<32x32xf32, #tpu.memory_space<vmem>>, vector<32x32xf32>
    %c0_29 = arith.constant 0 : index
    %c0_30 = arith.constant 0 : index
    %30 = vector.load %arg13[%c0_29, %c0_30] : memref<1x32xf32, #tpu.memory_space<vmem>>, vector<1x32xf32>
    %31 = vector.shape_cast %30 : vector<1x32xf32> to vector<1x32xf32>
    %32 = vector.broadcast %31 : vector<1x32xf32> to vector<8x32xf32>
    %33 = vector.extract_strided_slice %10 {offsets = [0, 0], sizes = [8, 8], strides = [1, 1]} : vector<8x32xf32> to vector<8x8xf32>
    %34 = vector.extract_strided_slice %15 {offsets = [0, 0], sizes = [8, 8], strides = [1, 1]} : vector<8x32xf32> to vector<8x8xf32>
    %35 = vector.extract_strided_slice %20 {offsets = [0, 0], sizes = [8, 8], strides = [1, 1]} : vector<8x32xf32> to vector<8x8xf32>
    %cst_31 = arith.constant dense<0.000000e+00> : vector<8x8xf32>
    %36 = tpu.matmul %33, %34, %cst_31 {dimension_numbers = #tpu.dot_dimension_numbers<[1], [1], [0], [0], [0, 0, 1, 0], [], []>} : vector<8x8xf32>, vector<8x8xf32>, vector<8x8xf32> -> vector<8x8xf32>
    %37 = arith.addf %36, %28 : vector<8x8xf32>
    %cst_32 = arith.constant dense<0xFF800000> : vector<8xf32>
    %38 = vector.multi_reduction <maximumf>, %37, %cst_32 [1] : vector<8x8xf32> to vector<8xf32>
    %39 = vector.shape_cast %38 : vector<8xf32> to vector<8x1xf32>
    %40 = vector.broadcast %39 : vector<8x1xf32> to vector<8x8xf32>
    %41 = arith.subf %37, %40 : vector<8x8xf32>
    %42 = math.exp %41 : vector<8x8xf32>
    %cst_33 = arith.constant dense<0.000000e+00> : vector<8xf32>
    %43 = vector.multi_reduction <add>, %42, %cst_33 [1] : vector<8x8xf32> to vector<8xf32>
    %44 = vector.shape_cast %43 : vector<8xf32> to vector<8x1xf32>
    %45 = tpu.reciprocal %44 : vector<8x1xf32> -> vector<8x1xf32>
    %46 = vector.broadcast %45 : vector<8x1xf32> to vector<8x8xf32>
    %47 = arith.mulf %42, %46 : vector<8x8xf32>
    %cst_34 = arith.constant dense<0.000000e+00> : vector<8x8xf32>
    %48 = tpu.matmul %47, %35, %cst_34 {dimension_numbers = #tpu.dot_dimension_numbers<[1], [0], [0], [1], [0, 0, 1, 1], [], []>} : vector<8x8xf32>, vector<8x8xf32>, vector<8x8xf32> -> vector<8x8xf32>
    %49 = vector.extract_strided_slice %29 {offsets = [0, 0], sizes = [8, 32], strides = [1, 1]} : vector<32x32xf32> to vector<8x32xf32>
    %cst_35 = arith.constant dense<0.000000e+00> : vector<8x32xf32>
    %50 = tpu.matmul %48, %49, %cst_35 {dimension_numbers = #tpu.dot_dimension_numbers<[1], [0], [0], [1], [0, 0, 1, 1], [], []>} : vector<8x8xf32>, vector<8x32xf32>, vector<8x32xf32> -> vector<8x32xf32>
    %51 = arith.addf %32, %50 : vector<8x32xf32>
    %52 = vector.extract_strided_slice %10 {offsets = [0, 8], sizes = [8, 8], strides = [1, 1]} : vector<8x32xf32> to vector<8x8xf32>
    %53 = vector.extract_strided_slice %15 {offsets = [0, 8], sizes = [8, 8], strides = [1, 1]} : vector<8x32xf32> to vector<8x8xf32>
    %54 = vector.extract_strided_slice %20 {offsets = [0, 8], sizes = [8, 8], strides = [1, 1]} : vector<8x32xf32> to vector<8x8xf32>
    %cst_36 = arith.constant dense<0.000000e+00> : vector<8x8xf32>
    %55 = tpu.matmul %52, %53, %cst_36 {dimension_numbers = #tpu.dot_dimension_numbers<[1], [1], [0], [0], [0, 0, 1, 0], [], []>} : vector<8x8xf32>, vector<8x8xf32>, vector<8x8xf32> -> vector<8x8xf32>
    %56 = arith.addf %55, %28 : vector<8x8xf32>
    %cst_37 = arith.constant dense<0xFF800000> : vector<8xf32>
    %57 = vector.multi_reduction <maximumf>, %56, %cst_37 [1] : vector<8x8xf32> to vector<8xf32>
    %58 = vector.shape_cast %57 : vector<8xf32> to vector<8x1xf32>
    %59 = vector.broadcast %58 : vector<8x1xf32> to vector<8x8xf32>
    %60 = arith.subf %56, %59 : vector<8x8xf32>
    %61 = math.exp %60 : vector<8x8xf32>
    %cst_38 = arith.constant dense<0.000000e+00> : vector<8xf32>
    %62 = vector.multi_reduction <add>, %61, %cst_38 [1] : vector<8x8xf32> to vector<8xf32>
    %63 = vector.shape_cast %62 : vector<8xf32> to vector<8x1xf32>
    %64 = tpu.reciprocal %63 : vector<8x1xf32> -> vector<8x1xf32>
    %65 = vector.broadcast %64 : vector<8x1xf32> to vector<8x8xf32>
    %66 = arith.mulf %61, %65 : vector<8x8xf32>
    %cst_39 = arith.constant dense<0.000000e+00> : vector<8x8xf32>
    %67 = tpu.matmul %66, %54, %cst_39 {dimension_numbers = #tpu.dot_dimension_numbers<[1], [0], [0], [1], [0, 0, 1, 1], [], []>} : vector<8x8xf32>, vector<8x8xf32>, vector<8x8xf32> -> vector<8x8xf32>
    %68 = vector.extract_strided_slice %29 {offsets = [8, 0], sizes = [8, 32], strides = [1, 1]} : vector<32x32xf32> to vector<8x32xf32>
    %cst_40 = arith.constant dense<0.000000e+00> : vector<8x32xf32>
    %69 = tpu.matmul %67, %68, %cst_40 {dimension_numbers = #tpu.dot_dimension_numbers<[1], [0], [0], [1], [0, 0, 1, 1], [], []>} : vector<8x8xf32>, vector<8x32xf32>, vector<8x32xf32> -> vector<8x32xf32>
    %70 = arith.addf %51, %69 : vector<8x32xf32>
    %71 = vector.extract_strided_slice %10 {offsets = [0, 16], sizes = [8, 8], strides = [1, 1]} : vector<8x32xf32> to vector<8x8xf32>
    %72 = vector.extract_strided_slice %15 {offsets = [0, 16], sizes = [8, 8], strides = [1, 1]} : vector<8x32xf32> to vector<8x8xf32>
    %73 = vector.extract_strided_slice %20 {offsets = [0, 16], sizes = [8, 8], strides = [1, 1]} : vector<8x32xf32> to vector<8x8xf32>
    %cst_41 = arith.constant dense<0.000000e+00> : vector<8x8xf32>
    %74 = tpu.matmul %71, %72, %cst_41 {dimension_numbers = #tpu.dot_dimension_numbers<[1], [1], [0], [0], [0, 0, 1, 0], [], []>} : vector<8x8xf32>, vector<8x8xf32>, vector<8x8xf32> -> vector<8x8xf32>
    %75 = arith.addf %74, %28 : vector<8x8xf32>
    %cst_42 = arith.constant dense<0xFF800000> : vector<8xf32>
    %76 = vector.multi_reduction <maximumf>, %75, %cst_42 [1] : vector<8x8xf32> to vector<8xf32>
    %77 = vector.shape_cast %76 : vector<8xf32> to vector<8x1xf32>
    %78 = vector.broadcast %77 : vector<8x1xf32> to vector<8x8xf32>
    %79 = arith.subf %75, %78 : vector<8x8xf32>
    %80 = math.exp %79 : vector<8x8xf32>
    %cst_43 = arith.constant dense<0.000000e+00> : vector<8xf32>
    %81 = vector.multi_reduction <add>, %80, %cst_43 [1] : vector<8x8xf32> to vector<8xf32>
    %82 = vector.shape_cast %81 : vector<8xf32> to vector<8x1xf32>
    %83 = tpu.reciprocal %82 : vector<8x1xf32> -> vector<8x1xf32>
    %84 = vector.broadcast %83 : vector<8x1xf32> to vector<8x8xf32>
    %85 = arith.mulf %80, %84 : vector<8x8xf32>
    %cst_44 = arith.constant dense<0.000000e+00> : vector<8x8xf32>
    %86 = tpu.matmul %85, %73, %cst_44 {dimension_numbers = #tpu.dot_dimension_numbers<[1], [0], [0], [1], [0, 0, 1, 1], [], []>} : vector<8x8xf32>, vector<8x8xf32>, vector<8x8xf32> -> vector<8x8xf32>
    %87 = vector.extract_strided_slice %29 {offsets = [16, 0], sizes = [8, 32], strides = [1, 1]} : vector<32x32xf32> to vector<8x32xf32>
    %cst_45 = arith.constant dense<0.000000e+00> : vector<8x32xf32>
    %88 = tpu.matmul %86, %87, %cst_45 {dimension_numbers = #tpu.dot_dimension_numbers<[1], [0], [0], [1], [0, 0, 1, 1], [], []>} : vector<8x8xf32>, vector<8x32xf32>, vector<8x32xf32> -> vector<8x32xf32>
    %89 = arith.addf %70, %88 : vector<8x32xf32>
    %90 = vector.extract_strided_slice %10 {offsets = [0, 24], sizes = [8, 8], strides = [1, 1]} : vector<8x32xf32> to vector<8x8xf32>
    %91 = vector.extract_strided_slice %15 {offsets = [0, 24], sizes = [8, 8], strides = [1, 1]} : vector<8x32xf32> to vector<8x8xf32>
    %92 = vector.extract_strided_slice %20 {offsets = [0, 24], sizes = [8, 8], strides = [1, 1]} : vector<8x32xf32> to vector<8x8xf32>
    %cst_46 = arith.constant dense<0.000000e+00> : vector<8x8xf32>
    %93 = tpu.matmul %90, %91, %cst_46 {dimension_numbers = #tpu.dot_dimension_numbers<[1], [1], [0], [0], [0, 0, 1, 0], [], []>} : vector<8x8xf32>, vector<8x8xf32>, vector<8x8xf32> -> vector<8x8xf32>
    %94 = arith.addf %93, %28 : vector<8x8xf32>
    %cst_47 = arith.constant dense<0xFF800000> : vector<8xf32>
    %95 = vector.multi_reduction <maximumf>, %94, %cst_47 [1] : vector<8x8xf32> to vector<8xf32>
    %96 = vector.shape_cast %95 : vector<8xf32> to vector<8x1xf32>
    %97 = vector.broadcast %96 : vector<8x1xf32> to vector<8x8xf32>
    %98 = arith.subf %94, %97 : vector<8x8xf32>
    %99 = math.exp %98 : vector<8x8xf32>
    %cst_48 = arith.constant dense<0.000000e+00> : vector<8xf32>
    %100 = vector.multi_reduction <add>, %99, %cst_48 [1] : vector<8x8xf32> to vector<8xf32>
    %101 = vector.shape_cast %100 : vector<8xf32> to vector<8x1xf32>
    %102 = tpu.reciprocal %101 : vector<8x1xf32> -> vector<8x1xf32>
    %103 = vector.broadcast %102 : vector<8x1xf32> to vector<8x8xf32>
    %104 = arith.mulf %99, %103 : vector<8x8xf32>
    %cst_49 = arith.constant dense<0.000000e+00> : vector<8x8xf32>
    %105 = tpu.matmul %104, %92, %cst_49 {dimension_numbers = #tpu.dot_dimension_numbers<[1], [0], [0], [1], [0, 0, 1, 1], [], []>} : vector<8x8xf32>, vector<8x8xf32>, vector<8x8xf32> -> vector<8x8xf32>
    %106 = vector.extract_strided_slice %29 {offsets = [24, 0], sizes = [8, 32], strides = [1, 1]} : vector<32x32xf32> to vector<8x32xf32>
    %cst_50 = arith.constant dense<0.000000e+00> : vector<8x32xf32>
    %107 = tpu.matmul %105, %106, %cst_50 {dimension_numbers = #tpu.dot_dimension_numbers<[1], [0], [0], [1], [0, 0, 1, 1], [], []>} : vector<8x8xf32>, vector<8x32xf32>, vector<8x32xf32> -> vector<8x32xf32>
    %108 = arith.addf %89, %107 : vector<8x32xf32>
    %c0_51 = arith.constant 0 : index
    %c0_52 = arith.constant 0 : index
    %c0_53 = arith.constant 0 : index
    %109 = vector.load %arg14[%c0_51, %c0_52, %c0_53] : memref<1x8x32xf32, #tpu.memory_space<vmem>>, vector<1x8x32xf32>
    %110 = vector.shape_cast %109 : vector<1x8x32xf32> to vector<8x32xf32>
    %111 = vector.shape_cast %108 : vector<8x32xf32> to vector<1x8x32xf32>
    tpu.vector_store %arg14[%c0_51, %c0_52, %c0_53], %111 {strides = array<i32>} : memref<1x8x32xf32, #tpu.memory_space<vmem>>, vector<1x8x32xf32>,
    return
  }
  func.func @transform_0(%arg0: i32, %arg1: i32) -> (i32, i32, i32) {
    %c0_i32 = arith.constant 0 : i32
    %c0_i32_0 = arith.constant 0 : i32
    return %arg0, %arg1, %c0_i32 : i32, i32, i32
  }
  func.func @transform_1(%arg0: i32, %arg1: i32) -> (i32, i32, i32) {
    %c0_i32 = arith.constant 0 : i32
    %c0_i32_0 = arith.constant 0 : i32
    %c0_i32_1 = arith.constant 0 : i32
    return %arg0, %c0_i32, %c0_i32_0 : i32, i32, i32
  }
  func.func @transform_2(%arg0: i32, %arg1: i32) -> (i32, i32, i32) {
    %c0_i32 = arith.constant 0 : i32
    %c0_i32_0 = arith.constant 0 : i32
    %c0_i32_1 = arith.constant 0 : i32
    return %arg0, %c0_i32, %c0_i32_0 : i32, i32, i32
  }
  func.func @transform_3(%arg0: i32, %arg1: i32) -> (i32, i32, i32) {
    %c0_i32 = arith.constant 0 : i32
    %c0_i32_0 = arith.constant 0 : i32
    %c0_i32_1 = arith.constant 0 : i32
    return %c0_i32, %arg1, %c0_i32_0 : i32, i32, i32
  }
  func.func @transform_4(%arg0: i32, %arg1: i32) -> (i32, i32) {
    %c0_i32 = arith.constant 0 : i32
    %c0_i32_0 = arith.constant 0 : i32
    %c0_i32_1 = arith.constant 0 : i32
    return %c0_i32, %c0_i32_0 : i32, i32
  }
  func.func @transform_5(%arg0: i32, %arg1: i32) -> (i32, i32) {
    %c0_i32 = arith.constant 0 : i32
    %c0_i32_0 = arith.constant 0 : i32
    %c0_i32_1 = arith.constant 0 : i32
    return %c0_i32, %c0_i32_0 : i32, i32
  }
  func.func @transform_6(%arg0: i32, %arg1: i32) -> (i32, i32) {
    %c0_i32 = arith.constant 0 : i32
    %c0_i32_0 = arith.constant 0 : i32
    %c0_i32_1 = arith.constant 0 : i32
    return %c0_i32, %c0_i32_0 : i32, i32
  }
  func.func @transform_7(%arg0: i32, %arg1: i32) -> (i32, i32) {
    %c0_i32 = arith.constant 0 : i32
    %c0_i32_0 = arith.constant 0 : i32
    %c0_i32_1 = arith.constant 0 : i32
    return %c0_i32, %c0_i32_0 : i32, i32
  }
  func.func @transform_8(%arg0: i32, %arg1: i32) -> (i32, i32) {
    %c0_i32 = arith.constant 0 : i32
    %c0_i32_0 = arith.constant 0 : i32
    %c0_i32_1 = arith.constant 0 : i32
    return %c0_i32, %c0_i32_0 : i32, i32
  }
  func.func @transform_9(%arg0: i32, %arg1: i32) -> (i32, i32) {
    %c0_i32 = arith.constant 0 : i32
    %c0_i32_0 = arith.constant 0 : i32
    %c0_i32_1 = arith.constant 0 : i32
    return %c0_i32, %c0_i32_0 : i32, i32
  }
  func.func @transform_10(%arg0: i32, %arg1: i32) -> (i32, i32) {
    %c0_i32 = arith.constant 0 : i32
    %c0_i32_0 = arith.constant 0 : i32
    %c0_i32_1 = arith.constant 0 : i32
    return %c0_i32, %c0_i32_0 : i32, i32
  }
  func.func @transform_11(%arg0: i32, %arg1: i32) -> (i32, i32) {
    %c0_i32 = arith.constant 0 : i32
    %c0_i32_0 = arith.constant 0 : i32
    %c0_i32_1 = arith.constant 0 : i32
    return %c0_i32, %c0_i32_0 : i32, i32
  }
  func.func @transform_12(%arg0: i32, %arg1: i32) -> (i32, i32, i32) {
    %c0_i32 = arith.constant 0 : i32
    %c0_i32_0 = arith.constant 0 : i32
    return %arg0, %arg1, %c0_i32 : i32, i32, i32
  }
}

</mosaic_0001>

<bundles_post_ra>
// kernel: tpu_custom_call.1
= control target key start
LH: loop header
LB: loop body
LE: loop exit
PB: predicated region body
PF: predicated region fallthrough
CT: control target
= control target key end

     0   :  { %s3622_s0 = inlined_call_operand.hbm [shape: f32[2,8,32], index: 0, kind: input, shape index: {}]   ;;  %s3623_s1 = inlined_call_operand.hbm [shape: f32[2,8,32], index: 1, kind: input, shape index: {}]   ;;  %s3624_s2 = inlined_call_operand.hbm [shape: f32[2,8,32], index: 2, kind: input, shape index: {}]   ;;  %s3625_s3 = inlined_call_operand.hbm [shape: s8[1,8,8], index: 3, kind: input, shape index: {}]   ;;  %s3626_s4 = inlined_call_operand.hbm [shape: f32[32,32], index: 4, kind: input, shape index: {}]   ;;  %s3627_s5 = inlined_call_operand.hbm [shape: f32[32,32], index: 5, kind: input, shape index: {}]   ;;  %s3628_s6 = inlined_call_operand.hbm [shape: f32[32,32], index: 6, kind: input, shape index: {}]   ;;  %s3629_s7 = inlined_call_operand.hbm [shape: f32[32,32], index: 7, kind: input, shape index: {}]   ;;  %s3630_s8 = inlined_call_operand.hbm [shape: f32[1,32], index: 8, kind: input, shape index: {}]   ;;  %s3631_s9 = inlined_call_operand.hbm [shape: f32[1,32], index: 9, kind: input, shape index: {}]   ;;  %s3632_s10 = inlined_call_operand.hbm [shape: f32[1,32], index: 10, kind: input, shape index: {}]   ;;  %s3633_s11 = inlined_call_operand.hbm [shape: f32[1,32], index: 11, kind: input, shape index: {}]   ;;  %s3634_s12 = inlined_call_operand.hbm [shape: f32[2,8,32], index: 12, kind: output, shape index: {}]  }
   0x1   :  { %3663 = sst [smem:[#allocation40_spill]] %s3623_s1 }
   0x2   :  { %3664 = sst [smem:[#allocation41_spill]] %s3624_s2 }
   0x3   :  { %3665 = sst [smem:[#allocation42_spill]] %s3625_s3 }
   0x4   :  { %3666 = sst [smem:[#allocation43_spill]] %s3626_s4 }
   0x5   :  { %3667 = sst [smem:[#allocation44_spill]] %s3627_s5 }
   0x6   :  { %3668 = sst [smem:[#allocation45_spill]] %s3629_s7 }
   0x7   :  { %3669 = sst [smem:[#allocation46_spill]] %s3631_s9 }
   0x8   :  { %3670 = sst [smem:[#allocation47_spill]] %s3634_s12 }
   0x9   :  { %17 = vsyncpa [#allocation3], 0 }
   0xa   :  { %19 = vsyncpa [#allocation3 + $0x1], 0 }
   0xb   :  { %20 = vsyncpa [#allocation6], 0 }
   0xc   :  { %22 = vsyncpa [#allocation6 + $0x1], 0 }
   0xd   :  { %23 = vsyncpa [#allocation9], 0 }
   0xe   :  { %24 = vsyncpa [#allocation12], 0 }
   0xf   :  { %25 = vsyncpa [#allocation15], 0 }
  0x10   :  { %26 = vsyncpa [#allocation18], 0 }
  0x11   :  { %27 = vsyncpa [#allocation21], 0 }
  0x12   :  { %28 = vsyncpa [#allocation4], 0 }
  0x13   :  { %30 = vsyncpa [#allocation4 + $0x1], 0  ;;  %s3035_s21 = smov 0   ;;  %s3037_s22 = smov 0  }
  0x14   :  { %s3039_s23 = smov 0   ;;  %s3041_s24 = smov 0  }
  0x15   :  { %s3043_s25 = smov 0   ;;  %s3045_s26 = smov 0  }
  0x16 LB: > { %3671 = sst [smem:[#allocation31_spill]] %s2927_s21  ;;  %s3066_s27 = sadd.s32 4294967295, %s2947_s26   ;;  %s2947_s26 = sphi %s3045_s26, %s36_s26   ;;  %s2943_s25 = sphi %s3043_s25, %s3730_s25   ;;  %s2939_s24 = sphi %s3041_s24, %s3729_s24   ;;  %s2935_s23 = sphi %s3039_s23, %s3733_s23   ;;  %s2931_s22 = sphi %s3037_s22, %s3732_s22   ;;  %s2927_s21 = sphi %s3035_s21, %s3731_s21  }
  0x17   : > { %3672 = sst [smem:[#allocation32_spill]] %s2939_s24  ;;  %p2098_p0 = scmp.ge.s32.totalorder %s2947_s26, 1 }
  0x18   : > { %3673 = sst [smem:[#allocation33_spill]] %s2943_s25  ;;  %p3636_p1 = scmp.eq.s32.totalorder %s3066_s27, 0 }
  0x19   : > { %3674 = sst [smem:[#allocation34_spill]] %s2947_s26  ;;  %p355_p2 = scmp.lt.s32.totalorder %s2947_s26, 3 }
  0x1a   : > { %s2949_s29 = smov [#allocation8]   ;;  %s2950_s14 = smov [#allocation11]  }
  0x1b   : > { %p3071_p3 = pnand %p2098_p0, %p355_p2  ;;  %s370_s30 = sshll.u32 %s2949_s29, 4  ;;  %s371_s30 = int_to_ptr.vmem [resolvable:$true] %s370_s30 }
  0x1c   : > { %s393_s15 = sshll.u32 %s2950_s14, 4  ;;  %s2951_s16 = smov [#allocation14]   ;;  %s3084_s15 = int_to_ptr.vmem [resolvable:$true] %s393_s15 }
  0x1d   : > { %s3675_s28 = scalar_select %p3071_p3, 1, 0 }
  0x1e   : > { %p2356_p5 = pneg %p3071_p3  ;;  %s3086_s17 = sshll.u32 %s2951_s16, 4  ;;  %s420_s17 = int_to_ptr.vmem [resolvable:$true] %s3086_s17 }
  0x1f   : > { %3676 = sst [smem:[#allocation35_spill]] %s3675_s28  ;;  %s3678_s3 = sld [smem:[#allocation42_spill]] }
  0x20   : > { %p3080_p6 = pnand %p2356_p5, %p3636_p1 }
  0x22   : > { %s3677_s13 = scalar_select %p3080_p6, 1, 0 }
  0x23   : > { %p3096_p8 = pneg %p3080_p6 }
  0x25   : > { %s2499_s20 = scalar_lea.hbm %s3678_s3, 32 }
  0x26   : > { %p2500_p7 = scmp.ne.s32.totalorder %s3678_s3, %s2499_s20  ;;  %p2506_p11 = scmp.lt.u32.totalorder %s2499_s20, %s3678_s3 }
  0x27   : > { %s3679_s24 = scalar_select %p3096_p8, 1, 0 }
  0x28   : > { %p2502_p9 = pnand %p3096_p8, %p2500_p7 }
  0x2a   : > { %p2503_p10 = pneg %p2502_p9 }
  0x2c   : > { %p2508_p12 = pnand %p2506_p11, %p2503_p10 }
  0x2e   : > { %2511 = shalt.err (!%p2508_p12)
}
  0x2f   : > { %s2512_s18 = scalar_lea.vmem %s371_s30, 32  ;;  %p2520_p5 = scmp.lt.s32.totalorder %s371_s30, %s371_s30 }
  0x30   : > { %p2513_p13 = scmp.ne.s32.totalorder %s371_s30, %s2512_s18  ;;  %p2521_p4 = scmp.lt.s32.totalorder %s2512_s18, %s2512_s18 }
  0x32   : > { %p2515_p0 = pnand %p2513_p13, %p3096_p8  ;;  %p2522_p1 = por %p2521_p4, %p2520_p5 }
  0x34   : > { %p2516_p2 = pneg %p2515_p0 }
  0x36   : > { %p2523_p3 = pnand %p2522_p1, %p2516_p2 }
  0x38   : > { %2526 = shalt.err (!%p2523_p3)
}
  0x39   : > { %2359 = dma.hbm_to_vmem [thread:$0]  (!%p3080_p6), %s3678_s3, 32, %s371_s30, [#allocation9]  }
  0x3a   : > { %s3680_s5 = sld [smem:[#allocation44_spill]] }
  0x40   : > { %s2527_s14 = scalar_lea.hbm %s3680_s5, 512 }
  0x41   : > { %p2528_p7 = scmp.ne.s32.totalorder %s3680_s5, %s2527_s14  ;;  %p2534_p1 = scmp.lt.u32.totalorder %s2527_s14, %s3680_s5 }
  0x43   : > { %p2530_p9 = pnand %p2528_p7, %p3096_p8 }
  0x45   : > { %p2531_p4 = pneg %p2530_p9 }
  0x47   : > { %p2536_p3 = pnand %p2534_p1, %p2531_p4 }
  0x49   : > { %2539 = shalt.err (!%p2536_p3)
}
  0x4a   : > { %s2540_s30 = scalar_lea.vmem %s3084_s15, 512  ;;  %p2548_p13 = scmp.lt.s32.totalorder %s3084_s15, %s3084_s15 }
  0x4b   : > { %p2541_p10 = scmp.ne.s32.totalorder %s3084_s15, %s2540_s30  ;;  %p2549_p0 = scmp.lt.s32.totalorder %s2540_s30, %s2540_s30 }
  0x4d   : > { %p2543_p11 = pnand %p2541_p10, %p3096_p8  ;;  %p2550_p2 = por %p2549_p0, %p2548_p13 }
  0x4f   : > { %p2544_p12 = pneg %p2543_p11 }
  0x51   : > { %p2551_p5 = pnand %p2550_p2, %p2544_p12 }
  0x53   : > { %2554 = shalt.err (!%p2551_p5)
}
  0x54   : > { %s3640_s28 = smov 128   ;;  %s3642_s2 = smov 8  }
  0x55   : > { %2365 = dma.hbm_to_vmem [thread:$0]  (!%p3080_p6), %s3680_s5, 512, %s3084_s15, [#allocation12], %s3640_s28, %s3640_s28, %s3642_s2  }
  0x56   : > { %s3681_s7 = sld [smem:[#allocation45_spill]] }
  0x5c   : > { %s2555_s14 = scalar_lea.hbm %s3681_s7, 512 }
  0x5d   : > { %p2556_p7 = scmp.ne.s32.totalorder %s3681_s7, %s2555_s14  ;;  %p2562_p1 = scmp.lt.u32.totalorder %s2555_s14, %s3681_s7 }
  0x5f   : > { %p2558_p9 = pnand %p2556_p7, %p3096_p8 }
  0x61   : > { %p2559_p4 = pneg %p2558_p9 }
  0x63   : > { %p2564_p3 = pnand %p2562_p1, %p2559_p4 }
  0x65   : > { %2567 = shalt.err (!%p2564_p3)
}
  0x66   : > { %s2568_s12 = scalar_lea.vmem %s420_s17, 512  ;;  %p2576_p13 = scmp.lt.s32.totalorder %s420_s17, %s420_s17 }
  0x67   : > { %p2569_p10 = scmp.ne.s32.totalorder %s420_s17, %s2568_s12  ;;  %p2577_p0 = scmp.lt.s32.totalorder %s2568_s12, %s2568_s12 }
  0x69   : > { %p2571_p11 = pnand %p2569_p10, %p3096_p8  ;;  %p2578_p2 = por %p2577_p0, %p2576_p13 }
  0x6b   : > { %p2572_p12 = pneg %p2571_p11 }
  0x6d   : > { %p2579_p5 = pnand %p2578_p2, %p2572_p12 }
  0x6f   : > { %2582 = shalt.err (!%p2579_p5)
}
  0x70   : > { %2371 = dma.hbm_to_vmem [thread:$0]  (!%p3080_p6), %s3681_s7, 512, %s420_s17, [#allocation15], %s3640_s28, %s3640_s28, %s3642_s2  }
  0x71   : > { %s2954_s19 = smov [#allocation17]   ;;  %s3682_s9 = sld [smem:[#allocation46_spill]] }
  0x72   : > { %s444_s20 = sshll.u32 %s2954_s19, 4  ;;  %s445_s20 = int_to_ptr.vmem [resolvable:$true] %s444_s20 }
  0x77   : > { %s2583_s16 = scalar_lea.hbm %s3682_s9, 16 }
  0x78   : > { %p2584_p7 = scmp.ne.s32.totalorder %s3682_s9, %s2583_s16  ;;  %p2590_p1 = scmp.lt.u32.totalorder %s2583_s16, %s3682_s9 }
  0x7a   : > { %p2586_p9 = pnand %p2584_p7, %p3096_p8 }
  0x7c   : > { %p2587_p4 = pneg %p2586_p9 }
  0x7e   : > { %p2592_p3 = pnand %p2590_p1, %p2587_p4 }
  0x80   : > { %2595 = shalt.err (!%p2592_p3)
}
  0x81   : > { %s2596_s17 = scalar_lea.vmem %s445_s20, 16  ;;  %s2603_s3 = scalar_lea.vmem %s445_s20, 32 }
  0x82   : > { %p2597_p10 = scmp.ne.s32.totalorder %s445_s20, %s2596_s17  ;;  %p2604_p13 = scmp.lt.s32.totalorder %s445_s20, %s445_s20 }
  0x83   : > { %p2605_p0 = scmp.lt.s32.totalorder %s2603_s3, %s2596_s17 }
  0x84   : > { %p2599_p11 = pnand %p2597_p10, %p3096_p8 }
  0x85   : > { %p2606_p2 = por %p2605_p0, %p2604_p13 }
  0x86   : > { %p2600_p12 = pneg %p2599_p11 }
  0x88   : > { %p2607_p5 = pnand %p2606_p2, %p2600_p12 }
  0x8a   : > { %2610 = shalt.err (!%p2607_p5)
}
  0x8b   : > { %2377 = dma.hbm_to_vmem [thread:$0]  (!%p3080_p6), %s3682_s9, 16, %s445_s20, [#allocation18]  }
  0x8c   : > { %s2097_s5 = sadd.s32 4294967294, %s2947_s26   ;;  %s48_s29 = sadd.s32 1, %s2943_s25 }
  0x8d   : > { %p50_p7 = scmp.ge.s32.totalorder %s48_s29, 2  ;;  %s57_s14 = sadd.s32 1, %s2935_s23 }
  0x8e   : > { %p64_p9 = scmp.ne.s32.totalorder %s2935_s23, %s2931_s22  ;;  %p65_p4 = scmp.eq.s32.totalorder %s2947_s26, 0 }
  0x8f   : > { %s3735_s29 = smov (%p50_p7, %s48_s29), 0  ;;  %p70_p3 = scmp.ne.s32.totalorder %s2931_s22, %s2927_s21 }
  0x90   : > { %3683 = sst [smem:[#allocation36_spill]] %s3735_s29  ;;  %p3186_p1 = por %p65_p4, %p64_p9 }
  0x91   : > { %s52_s20 = ssub.s32 %s2943_s25, %s3735_s29  ;;  %p342_p10 = scmp.eq.s32.totalorder %s3066_s27, 1 }
  0x92   : > { %p55_p11 = scmp.eq.s32.totalorder %s52_s20, 0  ;;  %p3685_p12 = scmp.eq.s32.totalorder %s3066_s27, 0 }
  0x93   : > { %p3201_p0 = por %p342_p10, %p64_p9  ;;  %p348_p2 = scmp.eq.s32.totalorder %s2097_s5, 1 }
  0x94   : > { %p3197_p13 = por %p3685_p12, %p70_p3  ;;  %p2407_p7 = scmp.lt.s32.totalorder %s2947_s26, 2 }
  0x95   : > { %s3687_s30 = scalar_select %p3201_p0, 1, 0 }
  0x96   : > { %s3686_s18 = scalar_select %p3197_p13, 1, 0 }
  0x97   : > { %3688 = sst [smem:[#allocation37_spill]] %s3687_s30  ;;  %p3208_p5 = por %p348_p2, %p70_p3 }
  0x98   : > { %s3206_s12 = scalar_select %p55_p11, %s2935_s23, %s57_s14  }
  0x99   : > { %s3690_s17 = scalar_select %p3208_p5, 1, 0 }
  0x9a   : > { %3689 = sst [smem:[#allocation38_spill]] %s3206_s12  ;;  %s3644_s3 = sand.u32 1, %s2935_s23  }
  0x9b   : > { %3691 = sst [smem:[#allocation39_spill]] %s3690_s17  ;;  %s3215_s15 = sshll.u32 %s2943_s25, 7 }
  0x9c   : > { %s3219_s19 = sshll.u32 %s3644_s3, 3  ;;  %p3223_p9 = pnand %p2407_p7, %p3186_p1 }
  0x9d   : > { %s496_s5 = sand.u32 1, %s2947_s26   ;;  %s3693_s1 = sld [smem:[#allocation40_spill]] }
  0x9e   : > { %s3692_s20 = scalar_select %p3223_p9, 1, 0 }
  0x9f   : > { %s500_s7 = scalar_lea.vmem [#allocation5], %s3219_s19  ;;  %s3237_s16 = scalar_lea.sflag [#allocation6], %s496_s5 }
  0xa0   : > { %s507_s3 = sshll.u32 %s500_s7, 4  ;;  %p3243_p1 = pneg %p3223_p9  ;;  %s3235_s3 = int_to_ptr.vmem [resolvable:$true] %s507_s3 }
  0xa2   : > { %s3694_s29 = scalar_select %p3243_p1, 1, 0 }
  0xa3   : > { %s3232_s2 = scalar_lea.hbm %s3693_s1, %s3215_s15  ;;  %s2616_s25 = scalar_lea.hbm %s3693_s1, 256 }
  0xa4   : > { %s2611_s9 = scalar_lea.hbm %s3232_s2, 128  ;;  %p2617_p11 = scmp.lt.u32.totalorder %s3232_s2, %s3693_s1 }
  0xa5   : > { %p2612_p4 = scmp.ne.s32.totalorder %s3232_s2, %s2611_s9  ;;  %p2618_p12 = scmp.lt.u32.totalorder %s2616_s25, %s2611_s9 }
  0xa6   : > { %p2620_p7 = scmp.lt.u32.totalorder %s2611_s9, %s3232_s2 }
  0xa7   : > { %p2614_p3 = pnand %p3243_p1, %p2612_p4  ;;  %p2619_p2 = por %p2618_p12, %p2617_p11 }
  0xa9   : > { %p2615_p10 = pneg %p2614_p3  ;;  %p2621_p5 = por %p2620_p7, %p2619_p2 }
  0xab   : > { %p2622_p0 = pnand %p2621_p5, %p2615_p10 }
  0xad   : > { %2625 = shalt.err (!%p2622_p0)
}
  0xae   : > { %s2626_s5 = scalar_lea.vmem %s3235_s3, 128  ;;  %s2955_s28 = smov [#allocation5]  }
  0xaf   : > { %p2627_p4 = scmp.ne.s32.totalorder %s3235_s3, %s2626_s5  ;;  %s2631_s14 = sshll.u32 %s2955_s28, 4  ;;  %s2632_s14 = int_to_ptr.vmem [resolvable:$false] %s2631_s14 }
  0xb0   : > { %s2633_s12 = scalar_lea.vmem %s2632_s14, 256  ;;  %p2634_p6 = scmp.lt.s32.totalorder %s3235_s3, %s2632_s14 }
  0xb1   : > { %p2629_p3 = pnand %p2627_p4, %p3243_p1  ;;  %p2635_p8 = scmp.lt.s32.totalorder %s2633_s12, %s2626_s5 }
  0xb3   : > { %p2630_p13 = pneg %p2629_p3  ;;  %p2636_p11 = por %p2635_p8, %p2634_p6 }
  0xb5   : > { %p2637_p12 = pnand %p2636_p11, %p2630_p13 }
  0xb7   : > { %2640 = shalt.err (!%p2637_p12)
}
  0xb8   : > { %2390 = dma.hbm_to_vmem [thread:$0]  (!%p3223_p9), %s3232_s2, 128, %s3235_s3, %s3237_s16  }
  0xb9   : > { %s2956_s9 = smov [#allocation10]   ;;  %s2957_s7 = smov [#allocation13]  }
  0xba   : > { %s380_s25 = sshll.u32 %s2956_s9, 4  ;;  %s406_s1 = sshll.u32 %s2957_s7, 4  ;;  %s381_s25 = int_to_ptr.vmem [resolvable:$true] %s380_s25  ;;  %s407_s1 = int_to_ptr.vmem [resolvable:$true] %s406_s1 }
  0xbb   : > { %s3695_s4 = sld [smem:[#allocation43_spill]]  ;;  %p3696_p8 = scmp.ne.s32.totalorder %s3679_s24, 0 }
  0xc1   : > { %s2641_s14 = scalar_lea.hbm %s3695_s4, 512 }
  0xc2   : > { %p2642_p6 = scmp.ne.s32.totalorder %s3695_s4, %s2641_s14  ;;  %p2648_p5 = scmp.lt.u32.totalorder %s2641_s14, %s3695_s4 }
  0xc4   : > { %p2644_p13 = pnand %p2642_p6, %p3696_p8 }
  0xc6   : > { %p2645_p0 = pneg %p2644_p13 }
  0xc8   : > { %p2650_p10 = pnand %p2648_p5, %p2645_p0 }
  0xca   : > { %2653 = shalt.err (!%p2650_p10)
}
  0xcb   : > { %s2654_s2 = scalar_lea.vmem %s381_s25, 512  ;;  %p2662_p3 = scmp.lt.s32.totalorder %s381_s25, %s381_s25 }
  0xcc   : > { %p2655_p2 = scmp.ne.s32.totalorder %s381_s25, %s2654_s2  ;;  %p2663_p11 = scmp.lt.s32.totalorder %s2654_s2, %s2654_s2 }
  0xce   : > { %p2657_p7 = pnand %p2655_p2, %p3696_p8  ;;  %p2664_p12 = por %p2663_p11, %p2662_p3 }
  0xd0   : > { %p2658_p4 = pneg %p2657_p7 }
  0xd2   : > { %p2665_p9 = pnand %p2664_p12, %p2658_p4 }
  0xd4   : > { %2668 = shalt.err (!%p2665_p9)
}
  0xd5   : > { %p3697_p6 = scmp.ne.s32.totalorder %s3677_s13, 0  ;;  %s3698_s26 = smov 8  }
  0xd6   : > { %s3699_s3 = smov 128   ;;  %s2669_s28 = scalar_lea.hbm %s3628_s6, 512 }
  0xd7   : > { %2362 = dma.hbm_to_vmem [thread:$0]  (!%p3697_p6), %s3695_s4, 512, %s381_s25, [#allocation9], %s3699_s3, %s3699_s3, %s3698_s26  }
  0xd8   : > { %p2670_p13 = scmp.ne.s32.totalorder %s3628_s6, %s2669_s28  ;;  %p2676_p5 = scmp.lt.u32.totalorder %s2669_s28, %s3628_s6 }
  0xda   : > { %p2672_p9 = pnand %p2670_p13, %p3696_p8 }
  0xdc   : > { %p2673_p0 = pneg %p2672_p9 }
  0xde   : > { %p2678_p10 = pnand %p2676_p5, %p2673_p0 }
  0xe0   : > { %2681 = shalt.err (!%p2678_p10)
}
  0xe1   : > { %s2682_s21 = scalar_lea.vmem %s407_s1, 512  ;;  %p2690_p3 = scmp.lt.s32.totalorder %s407_s1, %s407_s1 }
  0xe2   : > { %p2683_p2 = scmp.ne.s32.totalorder %s407_s1, %s2682_s21  ;;  %p2691_p11 = scmp.lt.s32.totalorder %s2682_s21, %s2682_s21 }
  0xe4   : > { %p2685_p7 = pnand %p2683_p2, %p3696_p8  ;;  %p2692_p12 = por %p2691_p11, %p2690_p3 }
  0xe6   : > { %p2686_p4 = pneg %p2685_p7 }
  0xe8   : > { %p2693_p1 = pnand %p2692_p12, %p2686_p4 }
  0xea   : > { %2696 = shalt.err (!%p2693_p1)
}
  0xeb   : > { %2368 = dma.hbm_to_vmem [thread:$0]  (!%p3697_p6), %s3628_s6, 512, %s407_s1, [#allocation12], %s3699_s3, %s3699_s3, %s3698_s26  }
  0xec   : > { %s2958_s9 = smov [#allocation16]   ;;  %s2959_s28 = smov [#allocation19]  }
  0xed   : > { %s433_s7 = sshll.u32 %s2958_s9, 4  ;;  %s455_s14 = sshll.u32 %s2959_s28, 4  ;;  %s434_s7 = int_to_ptr.vmem [resolvable:$true] %s433_s7  ;;  %s456_s14 = int_to_ptr.vmem [resolvable:$true] %s455_s14 }
  0xee   : > { %s2697_s2 = scalar_lea.hbm %s3630_s8, 16 }
  0xef   : > { %p2698_p1 = scmp.ne.s32.totalorder %s3630_s8, %s2697_s2  ;;  %p2704_p0 = scmp.lt.u32.totalorder %s2697_s2, %s3630_s8 }
  0xf1   : > { %p2700_p13 = pnand %p2698_p1, %p3696_p8 }
  0xf3   : > { %p2701_p9 = pneg %p2700_p13 }
  0xf5   : > { %p2706_p5 = pnand %p2704_p0, %p2701_p9 }
  0xf7   : > { %2709 = shalt.err (!%p2706_p5)
}
  0xf8   : > { %s2710_s1 = scalar_lea.vmem %s434_s7, 16  ;;  %s2717_s26 = scalar_lea.vmem %s434_s7, 32 }
  0xf9   : > { %p2711_p10 = scmp.ne.s32.totalorder %s434_s7, %s2710_s1  ;;  %p2718_p4 = scmp.lt.s32.totalorder %s434_s7, %s434_s7 }
  0xfa   : > { %p2719_p3 = scmp.lt.s32.totalorder %s2717_s26, %s2710_s1 }
  0xfb   : > { %p2713_p2 = pnand %p2711_p10, %p3696_p8 }
  0xfc   : > { %p2720_p11 = por %p2719_p3, %p2718_p4 }
  0xfd   : > { %p2714_p7 = pneg %p2713_p2 }
  0xff   : > { %p2721_p12 = pnand %p2720_p11, %p2714_p7 }
 0x101   : > { %2724 = shalt.err (!%p2721_p12)
}
 0x102   : > { %2374 = dma.hbm_to_vmem [thread:$0]  (!%p3697_p6), %s3630_s8, 16, %s434_s7, [#allocation15]  }
 0x103   : > { %s2725_s9 = scalar_lea.hbm %s3632_s10, 16 }
 0x104   : > { %p2726_p1 = scmp.ne.s32.totalorder %s3632_s10, %s2725_s9  ;;  %p2732_p0 = scmp.lt.u32.totalorder %s2725_s9, %s3632_s10 }
 0x106   : > { %p2728_p13 = pnand %p2726_p1, %p3696_p8 }
 0x108   : > { %p2729_p9 = pneg %p2728_p13 }
 0x10a   : > { %p2734_p5 = pnand %p2732_p0, %p2729_p9 }
 0x10c   : > { %2737 = shalt.err (!%p2734_p5)
}
 0x10d   : > { %s2738_s21 = scalar_lea.vmem %s456_s14, 16  ;;  %s2745_s7 = scalar_lea.vmem %s456_s14, 32 }
 0x10e   : > { %p2739_p10 = scmp.ne.s32.totalorder %s456_s14, %s2738_s21  ;;  %p2746_p4 = scmp.lt.s32.totalorder %s456_s14, %s456_s14 }
 0x10f   : > { %p2747_p3 = scmp.lt.s32.totalorder %s2745_s7, %s2738_s21 }
 0x110   : > { %p2741_p2 = pnand %p2739_p10, %p3696_p8 }
 0x111   : > { %p2748_p11 = por %p2747_p3, %p2746_p4 }
 0x112   : > { %p2742_p7 = pneg %p2741_p2 }
 0x114   : > { %p2749_p12 = pnand %p2748_p11, %p2742_p7 }
 0x116   : > { %2752 = shalt.err (!%p2749_p12)
}
 0x117   : > { %2380 = dma.hbm_to_vmem [thread:$0]  (!%p3697_p6), %s3632_s10, 16, %s456_s14, [#allocation18]  }
 0x118   : > { %s2960_s26 = smov [#allocation20]   ;;  %s2753_s17 = scalar_lea.hbm %s3633_s11, 16 }
 0x119   : > { %s466_s4 = sshll.u32 %s2960_s26, 4  ;;  %p2754_p1 = scmp.ne.s32.totalorder %s3633_s11, %s2753_s17  ;;  %s467_s4 = int_to_ptr.vmem [resolvable:$true] %s466_s4 }
 0x11a   : > { %p2760_p0 = scmp.lt.u32.totalorder %s2753_s17, %s3633_s11 }
 0x11b   : > { %p2756_p13 = pnand %p2754_p1, %p3696_p8 }
 0x11d   : > { %p2757_p9 = pneg %p2756_p13 }
 0x11f   : > { %p2762_p5 = pnand %p2760_p0, %p2757_p9 }
 0x121   : > { %2765 = shalt.err (!%p2762_p5)
}
 0x122   : > { %s2766_s14 = scalar_lea.vmem %s467_s4, 16  ;;  %s2773_s2 = scalar_lea.vmem %s467_s4, 32 }
 0x123   : > { %p2767_p10 = scmp.ne.s32.totalorder %s467_s4, %s2766_s14  ;;  %p2774_p4 = scmp.lt.s32.totalorder %s467_s4, %s467_s4 }
 0x124   : > { %p2775_p3 = scmp.lt.s32.totalorder %s2773_s2, %s2766_s14 }
 0x125   : > { %p2769_p2 = pnand %p2767_p10, %p3696_p8 }
 0x126   : > { %p2776_p11 = por %p2775_p3, %p2774_p4 }
 0x127   : > { %p2770_p7 = pneg %p2769_p2 }
 0x129   : > { %p2777_p12 = pnand %p2776_p11, %p2770_p7 }
 0x12b   : > { %2780 = shalt.err (!%p2777_p12)
}
 0x12c   : > { %2383 = dma.hbm_to_vmem [thread:$0]  (!%p3697_p6), %s3633_s11, 16, %s467_s4, [#allocation21]  }
 0x12d   : > { %s3367_s1 = scalar_lea.hbm %s3622_s0, %s3215_s15  ;;  %s481_s26 = scalar_lea.vmem [#allocation2], %s3219_s19 }
 0x12e   : > { %s489_s3 = sshll.u32 %s481_s26, 4  ;;  %s3700_s13 = sand.u32 1, %s2935_s23   ;;  %s490_s3 = int_to_ptr.vmem [resolvable:$true] %s489_s3 }
 0x12f   : > { %s478_s30 = scalar_lea.sflag [#allocation3], %s3700_s13  ;;  %s2781_s17 = scalar_lea.hbm %s3367_s1, 128 }
 0x130   : > { %p2782_p8 = scmp.ne.s32.totalorder %s3367_s1, %s2781_s17  ;;  %p3701_p1 = scmp.ne.s32.totalorder %s3694_s29, 0 }
 0x131   : > { %s2786_s28 = scalar_lea.hbm %s3622_s0, 256  ;;  %p2787_p6 = scmp.lt.u32.totalorder %s3367_s1, %s3622_s0 }
 0x132   : > { %p2784_p13 = pnand %p2782_p8, %p3701_p1  ;;  %p2788_p0 = scmp.lt.u32.totalorder %s2786_s28, %s2781_s17 }
 0x133   : > { %p2790_p10 = scmp.lt.u32.totalorder %s2781_s17, %s3367_s1 }
 0x134   : > { %p2785_p9 = pneg %p2784_p13  ;;  %p2789_p5 = por %p2788_p0, %p2787_p6 }
 0x136   : > { %p2791_p2 = por %p2790_p10, %p2789_p5 }
 0x138   : > { %p2792_p7 = pnand %p2791_p2, %p2785_p9 }
 0x13a   : > { %2795 = shalt.err (!%p2792_p7)
}
 0x13b   : > { %s2796_s14 = scalar_lea.vmem %s490_s3, 128  ;;  %s2961_s2 = smov [#allocation2]  }
 0x13c   : > { %p2797_p4 = scmp.ne.s32.totalorder %s490_s3, %s2796_s14  ;;  %s2801_s21 = sshll.u32 %s2961_s2, 4  ;;  %s2802_s21 = int_to_ptr.vmem [resolvable:$false] %s2801_s21 }
 0x13d   : > { %s2803_s7 = scalar_lea.vmem %s2802_s21, 256  ;;  %p2804_p12 = scmp.lt.s32.totalorder %s490_s3, %s2802_s21 }
 0x13e   : > { %p2799_p3 = pnand %p2797_p4, %p3701_p1  ;;  %p2805_p8 = scmp.lt.s32.totalorder %s2803_s7, %s2796_s14 }
 0x140   : > { %p2800_p11 = pneg %p2799_p3  ;;  %p2806_p13 = por %p2805_p8, %p2804_p12 }
 0x142   : > { %p2807_p0 = pnand %p2806_p13, %p2800_p11 }
 0x144   : > { %2810 = shalt.err (!%p2807_p0)
}
 0x145   : > { %p3702_p6 = scmp.ne.s32.totalorder %s3692_s20, 0  ;;  %s3703_s26 = sld [smem:[#allocation41_spill]] }
 0x146   : > { %s518_s4 = scalar_lea.vmem [#allocation7], %s3219_s19 }
 0x147   : > { %2387 = dma.hbm_to_vmem [thread:$0]  (!%p3702_p6), %s3367_s1, 128, %s490_s3, %s478_s30  }
 0x148   : > { %s525_s9 = sshll.u32 %s518_s4, 4  ;;  %s526_s9 = int_to_ptr.vmem [resolvable:$true] %s525_s9 }
 0x14b   : > { %s3704_s13 = smov %s3703_s26  ;;  %s3393_s17 = scalar_lea.hbm %s3703_s26, %s3215_s15 }
 0x14c   : > { %s2811_s28 = scalar_lea.hbm %s3393_s17, 128  ;;  %s2816_s1 = scalar_lea.hbm %s3704_s13, 256 }
 0x14d   : > { %p2812_p9 = scmp.ne.s32.totalorder %s3393_s17, %s2811_s28  ;;  %p2817_p2 = scmp.lt.u32.totalorder %s3393_s17, %s3704_s13 }
 0x14e   : > { %p2818_p7 = scmp.lt.u32.totalorder %s2816_s1, %s2811_s28  ;;  %p2820_p3 = scmp.lt.u32.totalorder %s2811_s28, %s3393_s17 }
 0x14f   : > { %p2814_p5 = pnand %p2812_p9, %p3701_p1 }
 0x150   : > { %p2819_p4 = por %p2818_p7, %p2817_p2 }
 0x151   : > { %p2815_p10 = pneg %p2814_p5 }
 0x152   : > { %p2821_p11 = por %p2820_p3, %p2819_p4 }
 0x154   : > { %p2822_p12 = pnand %p2821_p11, %p2815_p10 }
 0x156   : > { %2825 = shalt.err (!%p2822_p12)
}
 0x157   : > { %s2826_s15 = scalar_lea.vmem %s526_s9, 128  ;;  %s2962_s19 = smov [#allocation7]  }
 0x158   : > { %p2827_p8 = scmp.ne.s32.totalorder %s526_s9, %s2826_s15  ;;  %s2831_s14 = sshll.u32 %s2962_s19, 4  ;;  %s2832_s14 = int_to_ptr.vmem [resolvable:$false] %s2831_s14 }
 0x159   : > { %s2833_s2 = scalar_lea.vmem %s2832_s14, 256  ;;  %p2834_p9 = scmp.lt.s32.totalorder %s526_s9, %s2832_s14 }
 0x15a   : > { %p2829_p13 = pnand %p2827_p8, %p3701_p1  ;;  %p2835_p5 = scmp.lt.s32.totalorder %s2833_s2, %s2826_s15 }
 0x15c   : > { %p2830_p0 = pneg %p2829_p13  ;;  %p2836_p6 = por %p2835_p5, %p2834_p9 }
 0x15e   : > { %p2837_p2 = pnand %p2836_p6, %p2830_p0 }
 0x160   : > { %2840 = shalt.err (!%p2837_p2)
}
 0x161   : > { %p3705_p7 = scmp.ne.s32.totalorder %s3692_s20, 0  ;;  %s3706_s21 = sld [smem:[#allocation35_spill]] }
 0x163   : > { %2393 = dma.hbm_to_vmem [thread:$0]  (!%p3705_p7), %s3393_s17, 128, %s526_s9, %s3237_s16  }
 0x167   : > { %p3707_p10 = scmp.ne.s32.totalorder %s3706_s21, 0 }
 0x168   : > { %s3417_s29 = sand.u32 (!%p3707_p10), 1, %s2931_s22   ;;  %p3708_p1 = scmp.ne.s32.totalorder (!%p3707_p10), %s3686_s18, 0 }
 0x169   : > { %534 = sbr.rel (%p3707_p10) target bundleno = 2865 (0xb31), region = 68  ;;  %s3420_s7 = sshll.u32 (!%p3707_p10), %s3417_s29, 3 }
 0x16a   : > { %s537_s25 = scalar_lea.sflag (!%p3707_p10), [#allocation3], %s3417_s29  ;;  %s540_s24 = scalar_lea.vmem (!%p3707_p10), [#allocation2], %s3420_s7 }
 0x170   : > { %2894 = dma.done.wait (%p3708_p1), %s537_s25, 128  }
 0x171   : > { %2896 = vsyncadd (%p3708_p1), %s537_s25, 4294967168  ;;  %s545_s20 = sand.u32 1, %s3066_s27   ;;  %s549_s26 = scalar_lea.vmem [#allocation5], %s3420_s7 }
 0x172   : > { %s546_s16 = scalar_lea.sflag [#allocation6], %s545_s20 }
 0x173   : > { %2898 = dma.done.wait (%p3708_p1), %s546_s16, 256  }
 0x174   : > { %2900 = vsyncadd (%p3708_p1), %s546_s16, 4294967040  ;;  %s558_s17 = scalar_lea.vmem [#allocation7], %s3420_s7  ;;  %p3709_p6 = scmp.eq.s32.totalorder %s3066_s27, 0 }
 0x176   : > { %2902 = dma.done.wait (%p3709_p6), [#allocation9], 544   ;;  %p3710_p4 = pmov %p3709_p6 }
 0x178   : > { %2904 = vsyncadd (%p3710_p4), [#allocation9], 4294966752  ;;  %p3711_p3 = pmov %p3710_p4 }
 0x17a   : > { %2906 = dma.done.wait (%p3711_p3), [#allocation12], 1024   ;;  %p3712_p11 = pmov %p3711_p3 }
 0x17b   : > { %p3713_p12 = pmov %p3711_p3 }
 0x17c   : > { %2908 = vsyncadd (%p3712_p11), [#allocation12], 4294966272 }
 0x17d   : > { %2910 = dma.done.wait (%p3713_p12), [#allocation15], 528   ;;  %p3714_p8 = pmov %p3711_p3 }
 0x17e   : > { %p3715_p13 = pmov %p3711_p3 }
 0x17f   : > { %2912 = vsyncadd (%p3714_p8), [#allocation15], 4294966768 }
 0x180   : > { %2914 = dma.done.wait (%p3715_p13), [#allocation18], 32   ;;  %p3716_p0 = pmov %p3711_p3 }
 0x182   : > { %2916 = vsyncadd (%p3716_p0), [#allocation18], 4294967264  ;;  %p3717_p9 = pmov %p3716_p0 }
 0x183   : > { %p3718_p5 = pmov %p3716_p0 }
 0x184   : > { %2918 = dma.done.wait (%p3717_p9), [#allocation21], 16  }
 0x185   : > { %2920 = vsyncadd (%p3718_p5), [#allocation21], 4294967280  ;;  %v2963_v0 = vmov 0.0|0.0   ;;  %vm2964_vm0 = vmmov 0   ;;  %v2965_v1 = vmov 0.0   ;;  %v733_v2 = vld [vmem:[#allocation11] sm:$0xff] }
 0x186   : > { %2294 = vmatprep.subr.bf16.mxu1 %v2963_v0  ;;  %2288 = vmatprep.subr.bf16.mxu0 %v2963_v0  ;;  %v734_v3 = vld [vmem:[#allocation11 + $0x8] sm:$0xff]  ;;  %v648_v4 = vld [vmem:[#allocation10] sm:$0xff]  ;;  %v735_v7 = vld [vmem:[#allocation11 + $0x10] sm:$0xff]  ;;  %vm659_vm1 = vcmask 261120   ;;  %vm916_vm2 = vcmask 64512   ;;  %s2966_s27 = smov 120  }
 0x187   : > { %2214 = vmatprep.mubr.msk.f32.mxu1 %vm2964_vm0, %v2965_v1  ;;  %2203 = vmatprep.mubr.msk.f32.mxu0 %vm2964_vm0, %v2965_v1  ;;  %v2295_v5 = vpack.c.bf16 %v734_v3, %v733_v2  ;;  %v649_v6 = vld [vmem:[#allocation10 + $0x8] sm:$0xff]  ;;  %v736_v8 = vld [vmem:[#allocation11 + $0x18] sm:$0xff]  ;;  %v650_v10 = vld [vmem:[#allocation10 + $0x10] sm:$0xff]  ;;  %s2967_s18 = smov 112   ;;  %s2968_s4 = smov 104  }
 0x188   : > { %v2289_v9 = vpack.c.bf16 %v649_v6, %v648_v4  ;;  %v651_v11 = vld [vmem:[#allocation10 + $0x18] sm:$0xff]  ;;  %v2298_v12 = vpack.c.bf16 %v736_v8, %v735_v7  ;;  %v2131_v16 = vld [vmem:[#allocation17] ss:$0 sm:$0xff]  ;;  %v2129_v17 = vld [vmem:[#allocation16] ss:$0 sm:$0xff]  ;;  %s3719_s9 = sld [smem:[#allocation32_spill]] }
 0x189   : > { %2296 = vmatpush3.bf16.msra.mxu1 %v2295_v5  ;;  %v2292_v13 = vpack.c.bf16 %v651_v11, %v650_v10  ;;  %v646_v14 = vld [vmem:[%s549_s26] sm:$0xff]  ;;  %v645_v15 = vld [vmem:[%s540_s24] sm:$0xff]  ;;  %s3720_s28 = sld [smem:[#allocation37_spill]]  ;;  %s644_s12 = scalar_lea.vmem [#allocation22], %s3420_s7 }
 0x18a   : > { %2290 = vmatpush3.bf16.msra.mxu0 %v2289_v9  ;;  %2297 = vmatprep.subr.bf16.mxu1 %v2963_v0  ;;  %v817_v24 = vld [vmem:[#allocation13] sm:$0xff]  ;;  %v818_v25 = vld [vmem:[#allocation13 + $0x8] sm:$0xff]  ;;  %v819_v26 = vld [vmem:[#allocation13 + $0x10] sm:$0xff]  ;;  %s1885_s1 = sshll.u32 %s644_s12, 4  ;;  %s3721_s15 = sld [smem:[#allocation47_spill]]  ;;  %s3574_s1 = int_to_ptr.vmem [resolvable:$true] %s1885_s1 }
 0x18b   : > { %2291 = vmatprep.subr.bf16.mxu0 %v2963_v0  ;;  %v2301_v27 = vpack.c.bf16 %v818_v25, %v817_v24  ;;  %v820_v28 = vld [vmem:[#allocation13 + $0x18] sm:$0xff]  ;;  %v2133_v44 = vld [vmem:[#allocation19] ss:$0 sm:$0xff]  ;;  %v906_v24 = vld [vmem:[#allocation14 + $0x8] sm:$0xff]  ;;  %s1871_s14 = scalar_lea.sflag [#allocation4], %s3417_s29  ;;  %s2841_s2 = scalar_lea.vmem %s3574_s1, 128 }
 0x18c   : > { %v2304_v29 = vpack.c.bf16 %v820_v28, %v819_v26  ;;  %v647_v30 = vld [vmem:[%s558_s17] sm:$0xff]  ;;  %v901_v31 = vld [vmem:[#allocation8] sm:$0x3]  ;;  %v905_v50 = vld [vmem:[#allocation14] sm:$0xff]  ;;  %p2842_p2 = scmp.ne.s32.totalorder %s3574_s1, %s2841_s2  ;;  %s2969_s21 = smov [#allocation22]  }
 0x18d   : > { %2299 = vmatpush3.bf16.msra.mxu1 %v2298_v12  ;;  %v902_v32 = vunpack.c.0.s8 %v901_v31  ;;  %v907_v31 = vld [vmem:[#allocation14 + $0x10] sm:$0xff]  ;;  %s2845_s7 = sshll.u32 %s2969_s21, 4  ;;  %s2846_s7 = int_to_ptr.vmem [resolvable:$false] %s2845_s7 }
 0x18e   : > { %2293 = vmatpush3.bf16.msra.mxu0 %v2292_v13  ;;  %2228 = vmatprep.subr.mxu1 %v2965_v1  ;;  %s2153_s5 = sshll.u32 %s3719_s9, 7  ;;  %s2847_s25 = scalar_lea.vmem %s2846_s7, 256 }
 0x18f   : > { %2300 = vmatprep.subr.bf16.mxu0 %v2963_v0  ;;  %vm903_vm3 = vcmp.eq.s32.totalorder %v902_v32, 0  ;;  %p3722_p7 = scmp.ne.s32.totalorder %s3720_s28, 0  ;;  %p2848_p6 = scmp.lt.s32.totalorder %s3574_s1, %s2846_s7 }
 0x190   : > { %2215 = vmatmul.mubr.msk.f32.vlgmr.msra.gmra.mrb[0].mxu1 %vm659_vm1, %v646_v14  ;;  %v3494_v33 = vsel %vm903_vm3, -1e+09, %v2965_v1  ;;  %s3572_s19 = scalar_lea.hbm %s3721_s15, %s2153_s5  ;;  %p2849_p4 = scmp.lt.s32.totalorder %s2847_s25, %s2841_s2 }
 0x191   : > { %2204 = vmatmul.mubr.msk.f32.vlgmr.msra.gmra.mrb[0].mxu0 %vm659_vm1, %v645_v15  ;;  %2230 = vmatprep.mubr.msk.f32.mxu1 %vm2964_vm0, %v2965_v1  ;;  %p2843_p10 = pnand %p2842_p2, %p3722_p7 }
 0x192   : > { %2225 = vmatprep.mubr.msk.f32.mxu0 %vm2964_vm0, %v2965_v1  ;;  %2302 = vmatpush3.bf16.msra.mxu0 %v2301_v27  ;;  %p2850_p3 = por %p2849_p4, %p2848_p6 }
 0x193   : > { %2303 = vmatprep.subr.bf16.mxu0 %v2963_v0  ;;  %p2844_p1 = pneg %p2843_p10 }
 0x195   : > { %p2851_p11 = pnand %p2850_p3, %p2844_p1 }
 0x196   : > { %2305 = vmatpush3.bf16.msra.mxu0 %v2304_v29 }
 0x197   : > { %2248 = vmatprep.subr.mxu0 %v2965_v1 }
 0x199   : > { %2226 = vmatmul.mubr.msk.f32.vlgmr.msra.gmra.mrb[2].mxu0 %vm659_vm1, %v647_v30 }
 0x19a   : > { %2250 = vmatprep.mubr.msk.f32.mxu0 %vm2964_vm0, %v2965_v1 }
 0x263   : > { %v813_v18 = vpop.f32.mrb[0].mxu1 }
 0x264   : > { %v3470_v19 = vadd.f32 %v2131_v16, %v813_v18  ;;  %v2216_v20 = vpop.f32.mrb[1].mxu1  ;;  %v729_v21 = vpop.f32.mrb[0].mxu0 }
 0x265   : > { %v3472_v22 = vadd.f32 %v2129_v17, %v729_v21  ;;  %v2205_v23 = vpop.f32.mrb[1].mxu0 }
 0x266   : > { %1153 = vrot.lane.b32.xlu1 %v3470_v19, %s2966_s27  ;;  %2229 = vmatpush3.xpose.msk.msra.mxu1 %vm916_vm2, %v3470_v19 }
 0x267   : > { %2233 = vmatprep.subr.mxu1 %v2965_v1 }
 0x269   : > { %2231 = vmatmul.mubr.msk.f32.vlgmr.msra.gmra.mrb[2].mxu1 %vm916_vm2, %v3472_v22 }
 0x26a   : > { %1151 = vrot.lane.b32.xlu1 %v3472_v22, %s2966_s27  ;;  %2235 = vmatprep.mubr.msk.f32.mxu1 %vm2964_vm0, %v2965_v1 }
 0x26c   : > { %v897_v43 = vpop.f32.mrb[2].mxu0 }
 0x26d   : > { %v2227_v45 = vpop.f32.mrb[3].mxu0  ;;  %v3501_v46 = vadd.f32 %v2133_v44, %v897_v43  ;;  %v908_v43 = vld [vmem:[#allocation14 + $0x18] sm:$0xff] }
 0x26e   : > { %1391 = vrot.lane.b32.xlu1 %v3472_v22, %s2967_s18 }
 0x26f   : > { %2234 = vmatpush3.msra.mxu1 %v3501_v46 }
 0x270   : > { %2238 = vmatprep.subr.mxu1 %v2965_v1 }
 0x2d8   : > { %v1154_v51 = vpop.permute.xlu1 %1153 }
 0x2dc   : > { %v1152_v54 = vpop.permute.xlu1 %1151 }
 0x2e0   : > { %v1392_v56 = vpop.permute.xlu1 %1391 }
 0x33c   : > { %v989_v34 = vpop.f32.mrb[2].mxu1 }
 0x33d   : > { %v990_v35 = vadd.f32 %v989_v34, %v3494_v33  ;;  %v2232_v36 = vpop.f32.mrb[3].mxu1 }
 0x33f   : > { %v993_v37 = vsel %vm916_vm2, %v990_v35, -inf }
 0x340   : > { %994 = vmax.xlane.f32.xlu0 %v993_v37 }
 0x3cd   : > { %v995_v38 = vpop.xlane.xlu0 %994 }
 0x3ce   : > { %v996_v39 = vsub.f32 %v990_v35, %v995_v38 }
 0x3d0   : > { %v997_v40 = vmul.f32 1.442695, %v996_v39 }
 0x3d2   : > { %2483 = vpow2.f32 %v997_v40 }
 0x3dc   : > { %v2484_v41 = vpop.eup %2483 }
 0x3dd   : > { %v999_v42 = vsel %vm916_vm2, %v2484_v41, 0.0 }
 0x3de   : > { %1000 = vadd.xlane.f32.xlu0 %v999_v42 }
 0x3f4   : > { %1393 = vrot.lane.b32.xlu0 %v3470_v19, %s2967_s18 }
 0x46b   : > { %v1001_v47 = vpop.xlane.xlu0 %1000 }
 0x46c   : > { %2485 = vrcp.f32 %v1001_v47 }
 0x46f   : > { %v1394_v55 = vpop.permute.xlu0 %1393 }
 0x476   : > { %v2486_v48 = vpop.eup %2485 }
 0x477   : > { %v1003_v49 = vmul.f32 %v2486_v48, %v2484_v41 }
 0x479   : > { %2236 = vmatmul.mubr.msk.f32.vlgmr.msra.gmra.mrb[4].mxu1 %vm916_vm2, %v1003_v49 }
 0x47a   : > { %2239 = vmatpush3.msra.mxu1 %v905_v50  ;;  %2240 = vmatprep.mubr.msk.f32.mxu1 %vm2964_vm0, %v2965_v1 }
 0x47b   : > { %2243 = vmatprep.subr.mxu1 %v2965_v1 }
 0x54c   : > { %v1073_v52 = vpop.f32.mrb[4].mxu1 }
 0x54d   : > { %v2237_v53 = vpop.f32.mrb[5].mxu1  ;;  %2241 = vmatmul.mubr.msk.f32.vlgmr.msra.gmra.mrb[6].mxu1 %vm916_vm2, %v1073_v52 }
 0x54e   : > { %2244 = vmatpush3.xpose.msk.msra.mxu1 %vm916_vm2, %v1154_v51  ;;  %2245 = vmatprep.mubr.msk.f32.mxu1 %vm2964_vm0, %v2965_v1 }
 0x54f   : > { %2258 = vmatprep.subr.mxu1 %v2965_v1 }
 0x551   : > { %2246 = vmatmul.mubr.msk.f32.vlgmr.msra.gmra.mrb[8].mxu1 %vm916_vm2, %v1152_v54 }
 0x552   : > { %2259 = vmatpush3.xpose.msk.msra.mxu1 %vm916_vm2, %v1394_v55  ;;  %2260 = vmatprep.mubr.msk.f32.mxu1 %vm2964_vm0, %v2965_v1 }
 0x553   : > { %2263 = vmatprep.subr.mxu1 %v2965_v1 }
 0x555   : > { %2261 = vmatmul.mubr.msk.f32.vlgmr.msra.gmra.mrb[10].mxu1 %vm916_vm2, %v1392_v56 }
 0x556   : > { %2265 = vmatprep.mubr.msk.f32.mxu1 %vm2964_vm0, %v2965_v1 }
 0x620   : > { %v3522_v57 = vpop.f32.mrb[6].mxu1 }
 0x621   : > { %v2242_v58 = vpop.f32.mrb[7].mxu1 }
 0x624   : > { %v1225_v59 = vpop.f32.mrb[8].mxu1 }
 0x625   : > { %v2247_v60 = vpop.f32.mrb[9].mxu1  ;;  %v1226_v2 = vadd.f32 %v1225_v59, %v3494_v33 }
 0x627   : > { %v1229_v3 = vsel %vm916_vm2, %v1226_v2, -inf }
 0x628   : > { %v1465_v61 = vpop.f32.mrb[10].mxu1 }
 0x629   : > { %v1466_v62 = vadd.f32 %v1465_v61, %v3494_v33  ;;  %v2262_v63 = vpop.f32.mrb[11].mxu1 }
 0x62b   : > { %v1469_v0 = vsel %vm916_vm2, %v1466_v62, -inf }
 0x62c   : > { %1470 = vmax.xlane.f32.xlu1 %v1469_v0 }
 0x63d   : > { %1480 = vrot.lane.b32.xlu1 %v3501_v46, %s2967_s18 }
 0x641   : > { %1630 = vrot.lane.b32.xlu1 %v3472_v22, %s2968_s4 }
 0x665   : > { %1230 = vmax.xlane.f32.xlu1 %v1229_v3 }
 0x676   : > { %1241 = vrot.lane.b32.xlu1 %v3501_v46, %s2966_s27 }
 0x6b9   : > { %v1471_v4 = vpop.xlane.xlu1 %1470 }
 0x6ba   : > { %v1472_v5 = vsub.f32 %v1466_v62, %v1471_v4 }
 0x6bc   : > { %v1473_v6 = vmul.f32 1.442695, %v1472_v5 }
 0x6bd   : > { %v1481_v7 = vpop.permute.xlu1 %1480 }
 0x6be   : > { %2487 = vpow2.f32 %v1473_v6  ;;  %2264 = vmatpush3.msra.mxu1 %v1481_v7 }
 0x6bf   : > { %2273 = vmatprep.subr.mxu1 %v2965_v1 }
 0x6c1   : > { %v1631_v10 = vpop.permute.xlu1 %1630 }
 0x6c8   : > { %v2488_v8 = vpop.eup %2487 }
 0x6c9   : > { %v1475_v9 = vsel %vm916_vm2, %v2488_v8, 0.0 }
 0x6ca   : > { %1476 = vadd.xlane.f32.xlu0 %v1475_v9 }
 0x6e0   : > { %1632 = vrot.lane.b32.xlu0 %v3470_v19, %s2968_s4 }
 0x6f2   : > { %v1231_v11 = vpop.xlane.xlu1 %1230 }
 0x6f3   : > { %v1232_v12 = vsub.f32 %v1226_v2, %v1231_v11 }
 0x6f5   : > { %v1233_v13 = vmul.f32 1.442695, %v1232_v12 }
 0x6f6   : > { %v1242_v14 = vpop.permute.xlu1 %1241 }
 0x6f7   : > { %2489 = vpow2.f32 %v1233_v13  ;;  %2249 = vmatpush3.msra.mxu0 %v1242_v14 }
 0x6f8   : > { %2253 = vmatprep.subr.mxu0 %v2965_v1 }
 0x701   : > { %v2490_v15 = vpop.eup %2489 }
 0x702   : > { %v1235_v16 = vsel %vm916_vm2, %v2490_v15, 0.0 }
 0x703   : > { %1236 = vadd.xlane.f32.xlu0 %v1235_v16 }
 0x757   : > { %v1477_v17 = vpop.xlane.xlu0 %1476 }
 0x758   : > { %2491 = vrcp.f32 %v1477_v17 }
 0x75b   : > { %v1633_v21 = vpop.permute.xlu0 %1632 }
 0x762   : > { %v2492_v18 = vpop.eup %2491 }
 0x763   : > { %v1479_v20 = vmul.f32 %v2492_v18, %v2488_v8 }
 0x765   : > { %2266 = vmatmul.mubr.msk.f32.vlgmr.msra.gmra.mrb[12].mxu1 %vm916_vm2, %v1479_v20 }
 0x766   : > { %2274 = vmatpush3.xpose.msk.msra.mxu1 %vm916_vm2, %v1633_v21  ;;  %2275 = vmatprep.mubr.msk.f32.mxu1 %vm2964_vm0, %v2965_v1 }
 0x769   : > { %2276 = vmatmul.mubr.msk.f32.vlgmr.msra.gmra.mrb[14].mxu1 %vm916_vm2, %v1631_v10 }
 0x790   : > { %v1237_v19 = vpop.xlane.xlu0 %1236 }
 0x791   : > { %2493 = vrcp.f32 %v1237_v19 }
 0x79b   : > { %v2494_v22 = vpop.eup %2493 }
 0x79c   : > { %v1239_v23 = vmul.f32 %v2494_v22, %v2490_v15 }
 0x79e   : > { %2251 = vmatmul.mubr.msk.f32.vlgmr.msra.gmra.mrb[4].mxu0 %vm916_vm2, %v1239_v23 }
 0x79f   : > { %2255 = vmatprep.mubr.msk.f32.mxu0 %vm2964_vm0, %v2965_v1  ;;  %2254 = vmatpush3.msra.mxu0 %v906_v24 }
 0x7a0   : > { %2268 = vmatprep.subr.mxu0 %v2965_v1 }
 0x838   : > { %v1552_v25 = vpop.f32.mrb[12].mxu1 }
 0x839   : > { %v2267_v26 = vpop.f32.mrb[13].mxu1 }
 0x83c   : > { %v1704_v27 = vpop.f32.mrb[14].mxu1 }
 0x83d   : > { %v1705_v28 = vadd.f32 %v1704_v27, %v3494_v33  ;;  %v2277_v29 = vpop.f32.mrb[15].mxu1 }
 0x83f   : > { %v1708_v30 = vsel %vm916_vm2, %v1705_v28, -inf }
 0x840   : > { %1709 = vmax.xlane.f32.xlu0 %v1708_v30 }
 0x871   : > { %v1313_v32 = vpop.f32.mrb[4].mxu0 }
 0x872   : > { %v2252_v34 = vpop.f32.mrb[5].mxu0  ;;  %2256 = vmatmul.mubr.msk.f32.vlgmr.msra.gmra.mrb[6].mxu0 %vm916_vm2, %v1313_v32 }
 0x873   : > { %2269 = vmatpush3.msra.mxu0 %v907_v31  ;;  %2270 = vmatprep.mubr.msk.f32.mxu0 %vm2964_vm0, %v2965_v1 }
 0x874   : > { %2278 = vmatprep.subr.mxu0 %v2965_v1 }
 0x87a   : > { %2271 = vmatmul.mubr.msk.f32.vlgmr.msra.gmra.mrb[6].mxu0 %vm916_vm2, %v1552_v25 }
 0x87b   : > { %2280 = vmatprep.mubr.msk.f32.mxu0 %vm2964_vm0, %v2965_v1 }
 0x8cd   : > { %v1710_v33 = vpop.xlane.xlu0 %1709 }
 0x8ce   : > { %v1711_v35 = vsub.f32 %v1705_v28, %v1710_v33 }
 0x8d0   : > { %v1712_v36 = vmul.f32 1.442695, %v1711_v35 }
 0x8d2   : > { %2495 = vpow2.f32 %v1712_v36 }
 0x8dc   : > { %v2496_v37 = vpop.eup %2495 }
 0x8dd   : > { %v1714_v38 = vsel %vm916_vm2, %v2496_v37, 0.0 }
 0x8de   : > { %1715 = vadd.xlane.f32.xlu0 %v1714_v38 }
 0x8f4   : > { %1719 = vrot.lane.b32.xlu0 %v3501_v46, %s2968_s4  ;;  %v2135_v46 = vld [vmem:[#allocation20] ss:$0 sm:$0xff] }
 0x8f5   : > { %v1150_v47 = vadd.f32 %v2135_v46, %v3522_v57 }
 0x96b   : > { %v1716_v39 = vpop.xlane.xlu0 %1715 }
 0x96c   : > { %2497 = vrcp.f32 %v1716_v39 }
 0x96f   : > { %v1720_v40 = vpop.permute.xlu0 %1719 }
 0x970   : > { %2279 = vmatpush3.msra.mxu0 %v1720_v40 }
 0x971   : > { %2283 = vmatprep.subr.mxu0 %v2965_v1 }
 0x976   : > { %v2498_v41 = vpop.eup %2497 }
 0x977   : > { %v1718_v42 = vmul.f32 %v2498_v41, %v2496_v37 }
 0x979   : > { %2281 = vmatmul.mubr.msk.f32.vlgmr.msra.gmra.mrb[8].mxu0 %vm916_vm2, %v1718_v42 }
 0x97a   : > { %2284 = vmatpush3.msra.mxu0 %v908_v43  ;;  %2285 = vmatprep.mubr.msk.f32.mxu0 %vm2964_vm0, %v2965_v1 }
 0xa4c   : > { %v1791_v44 = vpop.f32.mrb[8].mxu0 }
 0xa4d   : > { %v2282_v45 = vpop.f32.mrb[9].mxu0  ;;  %2286 = vmatmul.mubr.msk.f32.vlgmr.msra.gmra.mrb[6].mxu0 %vm916_vm2, %v1791_v44 }
 0xb20   : > { %v1864_v48 = vpop.f32.mrb[6].mxu0 }
 0xb21   : > { %v2307_v49 = vadd.f32 %v1864_v48, %v1150_v47  ;;  %v2287_v50 = vpop.f32.mrb[7].mxu0 }
 0xb23   : > { %1869 = vst.msk [vmem:[%s644_s12] sm:$0xff] %vm659_vm1, %v2307_v49 }
 0xb24   : > { %2854 = shalt.err (!%p2851_p11)
}
 0xb25   : > { %s2855_s29 = scalar_lea.hbm %s3572_s19, 128  ;;  %s2859_s16 = scalar_lea.hbm %s3721_s15, 256 }
 0xb26   : > { %p2856_p12 = scmp.ne.s32.totalorder %s3572_s19, %s2855_s29  ;;  %p2860_p0 = scmp.lt.u32.totalorder %s3572_s19, %s3721_s15 }
 0xb27   : > { %p2861_p9 = scmp.lt.u32.totalorder %s2859_s16, %s2855_s29  ;;  %p2863_p2 = scmp.lt.u32.totalorder %s2855_s29, %s3572_s19 }
 0xb28   : > { %p2857_p8 = pnand %p2856_p12, %p3722_p7 }
 0xb29   : > { %p2862_p5 = por %p2861_p9, %p2860_p0 }
 0xb2a   : > { %p2858_p13 = pneg %p2857_p8 }
 0xb2b   : > { %p2864_p10 = por %p2863_p2, %p2862_p5 }
 0xb2d   : > { %p2865_p1 = pnand %p2864_p10, %p2858_p13 }
 0xb2f   : > { %2868 = shalt.err (!%p2865_p1)
}
 0xb30   : > { %2354 = dma.vmem_to_hbm [thread:$0]  (%p3722_p7), %s3574_s1, 128, %s3572_s19, %s1871_s14  }
 0xb31 PF: > { %s3723_s27 = sld [smem:[#allocation31_spill]]  ;;  %s3724_s18 = sld [smem:[#allocation39_spill]] }
 0xb32   : > { %s3725_s4 = sld [smem:[#allocation34_spill]] }
 0xb37   : > { %s1897_s9 = sand.u32 1, %s3723_s27   ;;  %p3726_p6 = scmp.ne.s32.totalorder %s3724_s18, 0 }
 0xb38   : > { %p3727_p4 = scmp.ge.s32.totalorder %s3725_s4, 2  ;;  %s1898_s5 = scalar_lea.sflag [#allocation4], %s1897_s9 }
 0xb3a   : > { %p2395_p3 = pnand %p3727_p4, %p3726_p6 }
 0xb3c   : > { %2922 = dma.done.wait (!%p2395_p3), %s1898_s5, 128  }
 0xb3d   : > { %2924 = vsyncadd (!%p2395_p3), %s1898_s5, 4294967168  ;;  %s36_s26 = sadd.s32 1, %s3725_s4   ;;  %s3728_s28 = sld [smem:[#allocation38_spill]] }
 0xb3e   : > { %p33_p11 = scmp.ge.s32.totalorder %s36_s26, 4   ;;  %s3729_s24 = sld [smem:[#allocation33_spill]] }
 0xb3f   : > { %s3730_s25 = sld [smem:[#allocation36_spill]]  ;;  %s3731_s21 = smov %s2931_s22 }
 0xb40   : > { %s3732_s22 = smov %s2935_s23  ;;  %35 = sbr.rel (!%p33_p11) target bundleno = 22 (0x16), region = 174 }
 0xb43   : > { %s3733_s23 = smov %s3728_s28 }
 0xb47   :  { %1903 = vsyncpa [#allocation3], 1 }
 0xb48   :  { %1905 = vsyncpa [#allocation3 + $0x1], 1 }
 0xb49   :  { %1906 = vsyncpa [#allocation6], 1 }
 0xb4a   :  { %1908 = vsyncpa [#allocation6 + $0x1], 1 }
 0xb4b   :  { %1909 = vsyncpa [#allocation9], 1 }
 0xb4c   :  { %1910 = vsyncpa [#allocation12], 1 }
 0xb4d   :  { %1911 = vsyncpa [#allocation15], 1 }
 0xb4e   :  { %1912 = vsyncpa [#allocation18], 1 }
 0xb4f   :  { %1913 = vsyncpa [#allocation21], 1 }
 0xb50   :  { %1914 = vsyncpa [#allocation4], 1 }
 0xb51   :  { %1916 = vsyncpa [#allocation4 + $0x1], 1 }

</bundles_post_ra>
